<compile_context>
chip_gen: v6e
topology: v6e:2x2x1
jax: 0.10.0
libtpu: 0.0.40
codegen_flags: <defaults>
</compile_context>

<pallas_src>
import functools

import jax
import jax.numpy as jnp
from jax.experimental import pallas as pl
from jax.experimental.pallas import tpu as pltpu


# ----------------------------------------------------------------------------
# Fused Pallas kernel
# ----------------------------------------------------------------------------
def _wn_fused_kernel(xs_ref, cs_ref, w_start_ref, b_start_ref,
                     w_tap_ref, w_cond_ref, b_big_ref, w_rs_ref, b_rs_ref,
                     w_end_ref, b_end_ref, out_ref,
                     *, n_layers, K, C, n_mel, tile_t, halo, pads, t_valid):
    n_buf = tile_t + 2 * halo
    cdt = w_tap_ref.dtype                        # MXU-operand dtype (f32/bf16)

    # Global time position of every buffer row.  Rows outside [0, t_valid) are
    # the virtual zero padding of the original sequence -> mask them to zero
    # after every residual update (matches the reference conv zero-padding).
    t0 = pl.program_id(1) * tile_t
    pos = t0 - halo + jax.lax.broadcasted_iota(jnp.int32, (n_buf, 1), 0)
    mask = jnp.logical_and(pos >= 0, pos < t_valid).astype(jnp.float32)

    x = xs_ref[0, 0]                             # (n_buf, n_in)   cdt
    cond = cs_ref[0, 0]                          # (n_buf, n_mel)  cdt

    # start 1x1 conv
    h = jnp.dot(x, w_start_ref[...], preferred_element_type=jnp.float32)
    h = (h + b_start_ref[...]) * mask            # (n_buf, C) f32, VMEM-resident

    skip = jnp.zeros((tile_t, C), jnp.float32)

    buf_off = 0          # buffer row corresponding to h[0]
    n = n_buf            # current valid length of h
    for i in range(n_layers):
        d = 2 ** i
        pad = pads[i]
        n_out = n - 2 * pad
        new_off = buf_off + pad

        # Dilated conv as K shifted matmuls (f32 accumulation on the MXU) plus
        # the conditioning projection; bias (b_in + b_c) folded on the host.
        h_c = h.astype(cdt)                      # one cast per layer (bf16 path)
        z = jnp.dot(cond[new_off:new_off + n_out, :], w_cond_ref[i],
                    preferred_element_type=jnp.float32)
        for k in range(K):
            z = z + jnp.dot(h_c[k * d:k * d + n_out, :], w_tap_ref[i, k],
                            preferred_element_type=jnp.float32)
        z = z + b_big_ref[i]

        # gated activation in f32 (v5e has no native bf16 VPU/EUP)
        acts = jnp.tanh(z[:, :C]) * jax.nn.sigmoid(z[:, C:])

        rs = jnp.dot(acts.astype(cdt), w_rs_ref[i],
                     preferred_element_type=jnp.float32) + b_rs_ref[i]

        # skip accumulation over the centre tile rows
        s0 = halo - new_off
        skip = skip + rs[s0:s0 + tile_t, C:]

        if i < n_layers - 1:
            # residual connection, re-masked at the global sequence boundary
            h = (rs[:, :C] + h[pad:pad + n_out, :]) * mask[new_off:new_off + n_out, :]
        buf_off = new_off
        n = n_out

    # end 1x1 conv, emitted channels-first (2*n_in, tile_t): the time axis is
    # on lanes (lane-dense stores) and already matches the NCL output layout.
    out_t = jax.lax.dot_general(
        w_end_ref[...], skip.astype(cdt),
        dimension_numbers=(((1,), (1,)), ((), ())),
        preferred_element_type=jnp.float32) + b_end_ref[...]
    out_ref[...] = out_t[None, None].astype(out_ref.dtype)


# ----------------------------------------------------------------------------
# Host-side weight preparation (weight_norm already folded; biases folded)
# ----------------------------------------------------------------------------
def _prep_weights(params, n_layers, C, K, n_mel, dtype):
    w_start = params["start"]["w"][:, :, 0].T.astype(dtype)          # (n_in, C)
    b_start = params["start"]["b"][None].astype(jnp.float32)          # (1, C)

    wt, wc, bb, wr, br = [], [], [], [], []
    for i in range(n_layers):
        lp = params[f"layer{i}"]
        # torch (2C, C, K) -> (K, C, 2C): per-tap weight slices for the MXU.
        wt.append(jnp.transpose(lp["w_in"], (2, 1, 0)))                # (K, C, 2C)
        wc.append(lp["w_c"][:, :, 0].T)                                # (n_mel, 2C)
        bb.append((lp["b_in"] + lp["b_c"])[None])                      # folded bias

        w_rs = lp["w_rs"][:, :, 0].T                                   # (C, rs_ch)
        b_rs = lp["b_rs"]
        if i == n_layers - 1:
            # Pad last layer's res/skip conv to 2C outputs as [zeros | w] so
            # rs[:, :C] == 0 (no residual) and rs[:, C:] == skip: all layers
            # become uniform and stackable.
            w_rs = jnp.concatenate([jnp.zeros((C, C), w_rs.dtype), w_rs], axis=1)
            b_rs = jnp.concatenate([jnp.zeros((C,), b_rs.dtype), b_rs])
        wr.append(w_rs)
        br.append(b_rs[None])

    W_tap = jnp.stack(wt).astype(dtype)          # (L, K, C, 2C)
    W_cond = jnp.stack(wc).astype(dtype)         # (L, n_mel, 2C)
    B_big = jnp.stack(bb).astype(jnp.float32)    # (L, 1, 2C)
    W_rs = jnp.stack(wr).astype(dtype)           # (L, C, 2C)
    B_rs = jnp.stack(br).astype(jnp.float32)     # (L, 1, 2C)
    w_end = params["end"]["w"][:, :, 0].astype(dtype)          # (2*n_in, C)
    b_end = params["end"]["b"][:, None].astype(jnp.float32)    # (2*n_in, 1)
    return w_start, b_start, W_tap, W_cond, B_big, W_rs, B_rs, w_end, b_end


# ----------------------------------------------------------------------------
# Forward pass (Pallas)
# ----------------------------------------------------------------------------
def wn_forward_pallas(params, audio, spect, n_layers, n_channels, kernel_size,
                      *, tile_t=None, compute_dtype=jnp.float32):
    # audio: (B, n_in, T), spect: (B, n_mel, T)  -- PyTorch NCL
    B, n_in, T = audio.shape
    n_mel = spect.shape[1]
    C, K = n_channels, kernel_size

    pads = tuple((2 ** i) * (K - 1) // 2 for i in range(n_layers))
    halo = sum(pads)                       # total receptive-field halo per side

    if tile_t is None:
        tile_t = min(T, 2048)              # production: as large as VMEM allows
    n_t = -(-T // tile_t)
    t_padded = n_t * tile_t
    n_buf = tile_t + 2 * halo

    x = jnp.transpose(audio, (0, 2, 1)).astype(jnp.float32)   # (B, T, n_in)
    c = jnp.transpose(spect, (0, 2, 1)).astype(jnp.float32)   # (B, T, n_mel)

    def build_slabs(arr):
        # (B, T, F) -> (B, n_t, n_buf, F): overlapping halo'd windows (done once
        # in plain XLA so the kernel's BlockSpecs stay simple and aligned).
        ap = jnp.pad(arr, ((0, 0), (halo, halo + t_padded - T), (0, 0)))
        idx = jnp.arange(n_t)[:, None] * tile_t + jnp.arange(n_buf)[None, :]
        return ap[:, idx, :].astype(compute_dtype)

    xs = build_slabs(x)                                        # (B, n_t, n_buf, n_in)
    cs = build_slabs(c)                                        # (B, n_t, n_buf, n_mel)

    (w_start, b_start, W_tap, W_cond, B_big, W_rs, B_rs, w_end, b_end) = (
        _prep_weights(params, n_layers, C, K, n_mel, compute_dtype))

    kern = functools.partial(
        _wn_fused_kernel, n_layers=n_layers, K=K, C=C, n_mel=n_mel,
        tile_t=tile_t, halo=halo, pads=pads, t_valid=T)

    out = pl.pallas_call(
        kern,
        out_shape=jax.ShapeDtypeStruct((B, n_t, 2 * n_in, tile_t), jnp.float32),
        grid=(B, n_t),
        in_specs=[
            pl.BlockSpec((1, 1, n_buf, n_in), lambda b, t: (b, t, 0, 0)),
            pl.BlockSpec((1, 1, n_buf, n_mel), lambda b, t: (b, t, 0, 0)),
            pl.BlockSpec(w_start.shape, lambda b, t: (0, 0)),
            pl.BlockSpec(b_start.shape, lambda b, t: (0, 0)),
            pl.BlockSpec(W_tap.shape, lambda b, t: (0, 0, 0, 0)),
            pl.BlockSpec(W_cond.shape, lambda b, t: (0, 0, 0)),
            pl.BlockSpec(B_big.shape, lambda b, t: (0, 0, 0)),
            pl.BlockSpec(W_rs.shape, lambda b, t: (0, 0, 0)),
            pl.BlockSpec(B_rs.shape, lambda b, t: (0, 0, 0)),
            pl.BlockSpec(w_end.shape, lambda b, t: (0, 0)),
            pl.BlockSpec(b_end.shape, lambda b, t: (0, 0)),
        ],
        out_specs=pl.BlockSpec((1, 1, 2 * n_in, tile_t), lambda b, t: (b, t, 0, 0)),
        compiler_params=pltpu.CompilerParams(
            dimension_semantics=("parallel", "parallel"),
            vmem_limit_bytes=48 * 1024 * 1024),   # safe on v5e/v6e/v7x
    )(xs, cs, w_start, b_start, W_tap, W_cond, B_big, W_rs, B_rs, w_end, b_end)

    # (B, n_t, 2*n_in, tile_t) -> (B, 2*n_in, T)   (tiny XLA transpose/reshape)
    out = jnp.transpose(out, (0, 2, 1, 3)).reshape(B, 2 * n_in, t_padded)
    return out[:, :, :T]


# ----------------------------------------------------------------------------
# Parameters (deterministic synthetic init; weight_norm applied analytically)
# ----------------------------------------------------------------------------
def _weight_norm_weight(key, cout, cin, k, scale=0.2):
    kv, kg = jax.random.split(key)
    v = jax.random.normal(kv, (cout, cin, k), jnp.float32) * scale
    g = jax.random.uniform(kg, (cout,), jnp.float32, 0.5, 1.5)
    norm = jnp.sqrt(jnp.sum(v * v, axis=(1, 2), keepdims=True)) + 1e-8
    return g[:, None, None] * v / norm          # torch layout (Cout, Cin, K)


def init_params(key, n_in, n_mel, n_layers, C, K):
    keys = jax.random.split(key, 2 + 6 * n_layers)
    params = {
        "start": {"w": _weight_norm_weight(keys[0], C, n_in, 1),
                  "b": jax.random.normal(keys[1], (C,), jnp.float32) * 0.05},
        # end conv is zero-initialized in the PyTorch module
        "end": {"w": jnp.zeros((2 * n_in, C, 1), jnp.float32),
                "b": jnp.zeros((2 * n_in,), jnp.float32)},
    }
    idx = 2
    for i in range(n_layers):
        rs_ch = 2 * C if i < n_layers - 1 else C
        params[f"layer{i}"] = {
            "w_in": _weight_norm_weight(keys[idx + 0], 2 * C, C, K),
            "b_in": jax.random.normal(keys[idx + 1], (2 * C,), jnp.float32) * 0.05,
            "w_c": _weight_norm_weight(keys[idx + 2], 2 * C, n_mel, 1),
            "b_c": jax.random.normal(keys[idx + 3], (2 * C,), jnp.float32) * 0.05,
            "w_rs": _weight_norm_weight(keys[idx + 4], rs_ch, C, 1),
            "b_rs": jax.random.normal(keys[idx + 5], (rs_ch,), jnp.float32) * 0.05,
        }
        idx += 6
    return params


# ----------------------------------------------------------------------------
# Pure-JAX reference (mirrors the PyTorch forward)
# ----------------------------------------------------------------------------
def _conv1d_ref(x, w, b, dilation=1, padding=0):
    out = jax.lax.conv_general_dilated(
        x, w, window_strides=(1,), padding=[(padding, padding)],
        rhs_dilation=(dilation,), dimension_numbers=("NCH", "OIH", "NCH"))
    return out + b[None, :, None]


def wn_forward_ref(params, audio, spect, n_layers, n_channels, kernel_size):
    a = _conv1d_ref(audio, params["start"]["w"], params["start"]["b"])
    output = None
    for i in range(n_layers):
        d = 2 ** i
        pad = d * (kernel_size - 1) // 2
        lp = params[f"layer{i}"]
        in_act = _conv1d_ref(a, lp["w_in"], lp["b_in"], dilation=d, padding=pad)
        cond = _conv1d_ref(spect, lp["w_c"], lp["b_c"])
        z = in_act + cond
        acts = jnp.tanh(z[:, :n_channels]) * jax.nn.sigmoid(z[:, n_channels:])
        rs = _conv1d_ref(acts, lp["w_rs"], lp["b_rs"])
        if i < n_layers - 1:
            a = rs[:, :n_channels] + a
            skip = rs[:, n_channels:]
        else:
            skip = rs
        output = skip if i == 0 else skip + output
    return _conv1d_ref(output, params["end"]["w"], params["end"]["b"])


# ----------------------------------------------------------------------------
if __name__ == "__main__":
    B, n_in, n_mel, C, T = 2, 4, 8, 32, 16
    n_layers, K = 3, 3

    params = init_params(jax.random.PRNGKey(0), n_in, n_mel, n_layers, C, K)
    ka, ks = jax.random.split(jax.random.PRNGKey(1))
    audio = jax.random.normal(ka, (B, n_in, T), jnp.float32)
    spect = jax.random.normal(ks, (B, n_mel, T), jnp.float32)

    # tile_t=8 -> two time tiles per batch element: exercises the halo /
    # boundary-masking logic of the fused kernel.
    out = wn_forward_pallas(params, audio, spect, n_layers, C, K, tile_t=8)
    out = jax.block_until_ready(out)
    assert out.shape == (B, 2 * n_in, T)
    # PyTorch zero-initializes the end conv -> output is exactly zero.
    assert jnp.allclose(out, jnp.zeros_like(out))

    # Correctness vs the pure-JAX reference with a non-zero end conv (otherwise
    # the comparison would be trivially zero).
    params_chk = dict(params)
    params_chk["end"] = {
        "w": jax.random.normal(jax.random.PRNGKey(2), (2 * n_in, C, 1),
                               jnp.float32) * 0.1,
        "b": jax.random.normal(jax.random.PRNGKey(3), (2 * n_in,),
                               jnp.float32) * 0.1,
    }
    ref = wn_forward_ref(params_chk, audio, spect, n_layers, C, K)
    for tt in (6, 8, 16):     # ragged tail, multi-tile, and single-tile paths
        got = wn_forward_pallas(params_chk, audio, spect, n_layers, C, K,
                                tile_t=tt)
        got = jax.block_until_ready(got)
        err = float(jnp.max(jnp.abs(got - ref)))
        assert jnp.allclose(got, ref, atol=1e-4, rtol=1e-4), (tt, err)

    # bf16 streaming path (v6e/v7x): weights + input slabs in bf16, f32 accum.
    got_bf16 = wn_forward_pallas(params_chk, audio, spect, n_layers, C, K,
                                 tile_t=8, compute_dtype=jnp.bfloat16)
    got_bf16 = jax.block_until_ready(got_bf16)
    assert bool(jnp.all(jnp.isfinite(got_bf16)))
    assert float(jnp.max(jnp.abs(got_bf16 - ref))) < 0.15

    print("KERNEL_OK")
</pallas_src>

<mosaic_0001>
module attributes {stable_mosaic.version = 11 : i64} {
  func.func @_wn_fused_kernel(%arg0: i32, %arg1: i32, %arg2: memref<1x1x22x4xf32, #tpu.memory_space<vmem>>, %arg3: memref<1x1x22x8xf32, #tpu.memory_space<vmem>>, %arg4: memref<4x32xf32, #tpu.memory_space<vmem>>, %arg5: memref<1x32xf32, #tpu.memory_space<vmem>>, %arg6: memref<3x3x32x64xf32, #tpu.memory_space<vmem>>, %arg7: memref<3x8x64xf32, #tpu.memory_space<vmem>>, %arg8: memref<3x1x64xf32, #tpu.memory_space<vmem>>, %arg9: memref<3x32x64xf32, #tpu.memory_space<vmem>>, %arg10: memref<3x1x64xf32, #tpu.memory_space<vmem>>, %arg11: memref<8x32xf32, #tpu.memory_space<vmem>>, %arg12: memref<8x1xf32, #tpu.memory_space<vmem>>, %arg13: memref<1x1x8x8xf32, #tpu.memory_space<vmem>>) attributes {dimension_semantics = [#tpu.dimension_semantics<parallel>, #tpu.dimension_semantics<parallel>], iteration_bounds = array<i64: 2, 2>, scalar_prefetch = 0 : i64, scratch_operands = 0 : i64, tpu.core_type = #tpu.core_type<tc>, window_params = [{transform_indices = @transform_0, window_bounds = array<i64: 1, 1, 22, 4>}, {transform_indices = @transform_1, window_bounds = array<i64: 1, 1, 22, 8>}, {pipeline_mode = #tpu.pipeline_mode<synchronous>, transform_indices = @transform_2, window_bounds = array<i64: 4, 32>}, {pipeline_mode = #tpu.pipeline_mode<synchronous>, transform_indices = @transform_3, window_bounds = array<i64: 1, 32>}, {pipeline_mode = #tpu.pipeline_mode<synchronous>, transform_indices = @transform_4, window_bounds = array<i64: 3, 3, 32, 64>}, {pipeline_mode = #tpu.pipeline_mode<synchronous>, transform_indices = @transform_5, window_bounds = array<i64: 3, 8, 64>}, {pipeline_mode = #tpu.pipeline_mode<synchronous>, transform_indices = @transform_6, window_bounds = array<i64: 3, 1, 64>}, {pipeline_mode = #tpu.pipeline_mode<synchronous>, transform_indices = @transform_7, window_bounds = array<i64: 3, 32, 64>}, {pipeline_mode = #tpu.pipeline_mode<synchronous>, transform_indices = @transform_8, window_bounds = array<i64: 3, 1, 64>}, {pipeline_mode = #tpu.pipeline_mode<synchronous>, transform_indices = @transform_9, window_bounds = array<i64: 8, 32>}, {pipeline_mode = #tpu.pipeline_mode<synchronous>, transform_indices = @transform_10, window_bounds = array<i64: 8, 1>}, {transform_indices = @transform_11, window_bounds = array<i64: 1, 1, 8, 8>}]} {
    %c8_i32 = arith.constant 8 : i32
    %0 = arith.muli %arg1, %c8_i32 : i32
    %c7_i32 = arith.constant 7 : i32
    %1 = arith.subi %0, %c7_i32 : i32
    %2 = tpu.iota {dimensions = array<i32: 0>} : vector<22x1xi32>
    %3 = vector.broadcast %1 : i32 to vector<22x1xi32>
    %4 = arith.addi %3, %2 : vector<22x1xi32>
    %c0_i32 = arith.constant 0 : i32
    %5 = vector.broadcast %c0_i32 : i32 to vector<22x1xi32>
    %6 = arith.cmpi sge, %4, %5 : vector<22x1xi32>
    %c16_i32 = arith.constant 16 : i32
    %7 = vector.broadcast %c16_i32 : i32 to vector<22x1xi32>
    %8 = arith.cmpi slt, %4, %7 : vector<22x1xi32>
    %9 = arith.andi %6, %8 : vector<22x1xi1>
    %10 = arith.extui %9 : vector<22x1xi1> to vector<22x1xi32>
    %11 = arith.sitofp %10 : vector<22x1xi32> to vector<22x1xf32>
    %c0 = arith.constant 0 : index
    %c0_0 = arith.constant 0 : index
    %c0_1 = arith.constant 0 : index
    %c0_2 = arith.constant 0 : index
    %12 = vector.load %arg2[%c0, %c0_0, %c0_1, %c0_2] : memref<1x1x22x4xf32, #tpu.memory_space<vmem>>, vector<1x1x22x4xf32>
    %13 = vector.shape_cast %12 : vector<1x1x22x4xf32> to vector<22x4xf32>
    %c0_3 = arith.constant 0 : index
    %c0_4 = arith.constant 0 : index
    %c0_5 = arith.constant 0 : index
    %c0_6 = arith.constant 0 : index
    %14 = vector.load %arg3[%c0_3, %c0_4, %c0_5, %c0_6] : memref<1x1x22x8xf32, #tpu.memory_space<vmem>>, vector<1x1x22x8xf32>
    %15 = vector.shape_cast %14 : vector<1x1x22x8xf32> to vector<22x8xf32>
    %c0_7 = arith.constant 0 : index
    %c0_8 = arith.constant 0 : index
    %16 = vector.load %arg4[%c0_7, %c0_8] : memref<4x32xf32, #tpu.memory_space<vmem>>, vector<4x32xf32>
    %cst = arith.constant dense<0.000000e+00> : vector<22x32xf32>
    %17 = tpu.matmul %13, %16, %cst {dimension_numbers = #tpu.dot_dimension_numbers<[1], [0], [0], [1], [0, 0, 1, 1], [], []>} : vector<22x4xf32>, vector<4x32xf32>, vector<22x32xf32> -> vector<22x32xf32>
    %c0_9 = arith.constant 0 : index
    %c0_10 = arith.constant 0 : index
    %18 = vector.load %arg5[%c0_9, %c0_10] : memref<1x32xf32, #tpu.memory_space<vmem>>, vector<1x32xf32>
    %19 = vector.broadcast %18 : vector<1x32xf32> to vector<22x32xf32>
    %20 = arith.addf %17, %19 : vector<22x32xf32>
    %21 = vector.broadcast %11 : vector<22x1xf32> to vector<22x32xf32>
    %22 = arith.mulf %20, %21 : vector<22x32xf32>
    %cst_11 = arith.constant 0.000000e+00 : f32
    %23 = vector.broadcast %cst_11 : f32 to vector<8x32xf32>
    %24 = vector.extract_strided_slice %15 {offsets = [1, 0], sizes = [20, 8], strides = [1, 1]} : vector<22x8xf32> to vector<20x8xf32>
    %c0_12 = arith.constant 0 : index
    %c0_13 = arith.constant 0 : index
    %c0_14 = arith.constant 0 : index
    %25 = vector.load %arg7[%c0_12, %c0_13, %c0_14] : memref<3x8x64xf32, #tpu.memory_space<vmem>>, vector<1x8x64xf32>
    %26 = vector.shape_cast %25 : vector<1x8x64xf32> to vector<8x64xf32>
    %cst_15 = arith.constant dense<0.000000e+00> : vector<20x64xf32>
    %27 = tpu.matmul %24, %26, %cst_15 {dimension_numbers = #tpu.dot_dimension_numbers<[1], [0], [0], [1], [0, 0, 1, 1], [], []>} : vector<20x8xf32>, vector<8x64xf32>, vector<20x64xf32> -> vector<20x64xf32>
    %28 = vector.extract_strided_slice %22 {offsets = [0, 0], sizes = [20, 32], strides = [1, 1]} : vector<22x32xf32> to vector<20x32xf32>
    %c0_16 = arith.constant 0 : index
    %c0_17 = arith.constant 0 : index
    %c0_18 = arith.constant 0 : index
    %c0_19 = arith.constant 0 : index
    %29 = vector.load %arg6[%c0_16, %c0_17, %c0_18, %c0_19] : memref<3x3x32x64xf32, #tpu.memory_space<vmem>>, vector<1x1x32x64xf32>
    %30 = vector.shape_cast %29 : vector<1x1x32x64xf32> to vector<32x64xf32>
    %cst_20 = arith.constant dense<0.000000e+00> : vector<20x64xf32>
    %31 = tpu.matmul %28, %30, %cst_20 {dimension_numbers = #tpu.dot_dimension_numbers<[1], [0], [0], [1], [0, 0, 1, 1], [], []>} : vector<20x32xf32>, vector<32x64xf32>, vector<20x64xf32> -> vector<20x64xf32>
    %32 = arith.addf %27, %31 : vector<20x64xf32>
    %33 = vector.extract_strided_slice %22 {offsets = [1, 0], sizes = [20, 32], strides = [1, 1]} : vector<22x32xf32> to vector<20x32xf32>
    %c0_21 = arith.constant 0 : index
    %c1 = arith.constant 1 : index
    %c0_22 = arith.constant 0 : index
    %c0_23 = arith.constant 0 : index
    %34 = vector.load %arg6[%c0_21, %c1, %c0_22, %c0_23] : memref<3x3x32x64xf32, #tpu.memory_space<vmem>>, vector<1x1x32x64xf32>
    %35 = vector.shape_cast %34 : vector<1x1x32x64xf32> to vector<32x64xf32>
    %cst_24 = arith.constant dense<0.000000e+00> : vector<20x64xf32>
    %36 = tpu.matmul %33, %35, %cst_24 {dimension_numbers = #tpu.dot_dimension_numbers<[1], [0], [0], [1], [0, 0, 1, 1], [], []>} : vector<20x32xf32>, vector<32x64xf32>, vector<20x64xf32> -> vector<20x64xf32>
    %37 = arith.addf %32, %36 : vector<20x64xf32>
    %38 = vector.extract_strided_slice %22 {offsets = [2, 0], sizes = [20, 32], strides = [1, 1]} : vector<22x32xf32> to vector<20x32xf32>
    %c0_25 = arith.constant 0 : index
    %c2 = arith.constant 2 : index
    %c0_26 = arith.constant 0 : index
    %c0_27 = arith.constant 0 : index
    %39 = vector.load %arg6[%c0_25, %c2, %c0_26, %c0_27] : memref<3x3x32x64xf32, #tpu.memory_space<vmem>>, vector<1x1x32x64xf32>
    %40 = vector.shape_cast %39 : vector<1x1x32x64xf32> to vector<32x64xf32>
    %cst_28 = arith.constant dense<0.000000e+00> : vector<20x64xf32>
    %41 = tpu.matmul %38, %40, %cst_28 {dimension_numbers = #tpu.dot_dimension_numbers<[1], [0], [0], [1], [0, 0, 1, 1], [], []>} : vector<20x32xf32>, vector<32x64xf32>, vector<20x64xf32> -> vector<20x64xf32>
    %42 = arith.addf %37, %41 : vector<20x64xf32>
    %c0_29 = arith.constant 0 : index
    %c0_30 = arith.constant 0 : index
    %c0_31 = arith.constant 0 : index
    %43 = vector.load %arg8[%c0_29, %c0_30, %c0_31] : memref<3x1x64xf32, #tpu.memory_space<vmem>>, vector<1x1x64xf32>
    %44 = vector.shape_cast %43 : vector<1x1x64xf32> to vector<1x64xf32>
    %45 = vector.broadcast %44 : vector<1x64xf32> to vector<20x64xf32>
    %46 = arith.addf %42, %45 : vector<20x64xf32>
    %47 = vector.extract_strided_slice %46 {offsets = [0, 0], sizes = [20, 32], strides = [1, 1]} : vector<20x64xf32> to vector<20x32xf32>
    %48 = math.tanh %47 : vector<20x32xf32>
    %49 = vector.extract_strided_slice %46 {offsets = [0, 32], sizes = [20, 32], strides = [1, 1]} : vector<20x64xf32> to vector<20x32xf32>
    %50 = arith.negf %49 : vector<20x32xf32>
    %51 = math.exp %50 : vector<20x32xf32>
    %cst_32 = arith.constant 1.000000e+00 : f32
    %52 = vector.broadcast %cst_32 : f32 to vector<20x32xf32>
    %53 = arith.addf %52, %51 : vector<20x32xf32>
    %54 = arith.divf %52, %53 : vector<20x32xf32>
    %55 = arith.mulf %48, %54 : vector<20x32xf32>
    %c0_33 = arith.constant 0 : index
    %c0_34 = arith.constant 0 : index
    %c0_35 = arith.constant 0 : index
    %56 = vector.load %arg9[%c0_33, %c0_34, %c0_35] : memref<3x32x64xf32, #tpu.memory_space<vmem>>, vector<1x32x64xf32>
    %57 = vector.shape_cast %56 : vector<1x32x64xf32> to vector<32x64xf32>
    %cst_36 = arith.constant dense<0.000000e+00> : vector<20x64xf32>
    %58 = tpu.matmul %55, %57, %cst_36 {dimension_numbers = #tpu.dot_dimension_numbers<[1], [0], [0], [1], [0, 0, 1, 1], [], []>} : vector<20x32xf32>, vector<32x64xf32>, vector<20x64xf32> -> vector<20x64xf32>
    %c0_37 = arith.constant 0 : index
    %c0_38 = arith.constant 0 : index
    %c0_39 = arith.constant 0 : index
    %59 = vector.load %arg10[%c0_37, %c0_38, %c0_39] : memref<3x1x64xf32, #tpu.memory_space<vmem>>, vector<1x1x64xf32>
    %60 = vector.shape_cast %59 : vector<1x1x64xf32> to vector<1x64xf32>
    %61 = vector.broadcast %60 : vector<1x64xf32> to vector<20x64xf32>
    %62 = arith.addf %58, %61 : vector<20x64xf32>
    %63 = vector.extract_strided_slice %62 {offsets = [6, 32], sizes = [8, 32], strides = [1, 1]} : vector<20x64xf32> to vector<8x32xf32>
    %64 = arith.addf %23, %63 : vector<8x32xf32>
    %65 = vector.extract_strided_slice %62 {offsets = [0, 0], sizes = [20, 32], strides = [1, 1]} : vector<20x64xf32> to vector<20x32xf32>
    %66 = vector.extract_strided_slice %22 {offsets = [1, 0], sizes = [20, 32], strides = [1, 1]} : vector<22x32xf32> to vector<20x32xf32>
    %67 = arith.addf %65, %66 : vector<20x32xf32>
    %68 = vector.extract_strided_slice %11 {offsets = [1, 0], sizes = [20, 1], strides = [1, 1]} : vector<22x1xf32> to vector<20x1xf32>
    %69 = vector.broadcast %68 : vector<20x1xf32> to vector<20x32xf32>
    %70 = arith.mulf %67, %69 : vector<20x32xf32>
    %71 = vector.extract_strided_slice %15 {offsets = [3, 0], sizes = [16, 8], strides = [1, 1]} : vector<22x8xf32> to vector<16x8xf32>
    %c1_40 = arith.constant 1 : index
    %c0_41 = arith.constant 0 : index
    %c0_42 = arith.constant 0 : index
    %72 = vector.load %arg7[%c1_40, %c0_41, %c0_42] : memref<3x8x64xf32, #tpu.memory_space<vmem>>, vector<1x8x64xf32>
    %73 = vector.shape_cast %72 : vector<1x8x64xf32> to vector<8x64xf32>
    %cst_43 = arith.constant dense<0.000000e+00> : vector<16x64xf32>
    %74 = tpu.matmul %71, %73, %cst_43 {dimension_numbers = #tpu.dot_dimension_numbers<[1], [0], [0], [1], [0, 0, 1, 1], [], []>} : vector<16x8xf32>, vector<8x64xf32>, vector<16x64xf32> -> vector<16x64xf32>
    %75 = vector.extract_strided_slice %70 {offsets = [0, 0], sizes = [16, 32], strides = [1, 1]} : vector<20x32xf32> to vector<16x32xf32>
    %c1_44 = arith.constant 1 : index
    %c0_45 = arith.constant 0 : index
    %c0_46 = arith.constant 0 : index
    %c0_47 = arith.constant 0 : index
    %76 = vector.load %arg6[%c1_44, %c0_45, %c0_46, %c0_47] : memref<3x3x32x64xf32, #tpu.memory_space<vmem>>, vector<1x1x32x64xf32>
    %77 = vector.shape_cast %76 : vector<1x1x32x64xf32> to vector<32x64xf32>
    %cst_48 = arith.constant dense<0.000000e+00> : vector<16x64xf32>
    %78 = tpu.matmul %75, %77, %cst_48 {dimension_numbers = #tpu.dot_dimension_numbers<[1], [0], [0], [1], [0, 0, 1, 1], [], []>} : vector<16x32xf32>, vector<32x64xf32>, vector<16x64xf32> -> vector<16x64xf32>
    %79 = arith.addf %74, %78 : vector<16x64xf32>
    %80 = vector.extract_strided_slice %70 {offsets = [2, 0], sizes = [16, 32], strides = [1, 1]} : vector<20x32xf32> to vector<16x32xf32>
    %c1_49 = arith.constant 1 : index
    %c1_50 = arith.constant 1 : index
    %c0_51 = arith.constant 0 : index
    %c0_52 = arith.constant 0 : index
    %81 = vector.load %arg6[%c1_49, %c1_50, %c0_51, %c0_52] : memref<3x3x32x64xf32, #tpu.memory_space<vmem>>, vector<1x1x32x64xf32>
    %82 = vector.shape_cast %81 : vector<1x1x32x64xf32> to vector<32x64xf32>
    %cst_53 = arith.constant dense<0.000000e+00> : vector<16x64xf32>
    %83 = tpu.matmul %80, %82, %cst_53 {dimension_numbers = #tpu.dot_dimension_numbers<[1], [0], [0], [1], [0, 0, 1, 1], [], []>} : vector<16x32xf32>, vector<32x64xf32>, vector<16x64xf32> -> vector<16x64xf32>
    %84 = arith.addf %79, %83 : vector<16x64xf32>
    %85 = vector.extract_strided_slice %70 {offsets = [4, 0], sizes = [16, 32], strides = [1, 1]} : vector<20x32xf32> to vector<16x32xf32>
    %c1_54 = arith.constant 1 : index
    %c2_55 = arith.constant 2 : index
    %c0_56 = arith.constant 0 : index
    %c0_57 = arith.constant 0 : index
    %86 = vector.load %arg6[%c1_54, %c2_55, %c0_56, %c0_57] : memref<3x3x32x64xf32, #tpu.memory_space<vmem>>, vector<1x1x32x64xf32>
    %87 = vector.shape_cast %86 : vector<1x1x32x64xf32> to vector<32x64xf32>
    %cst_58 = arith.constant dense<0.000000e+00> : vector<16x64xf32>
    %88 = tpu.matmul %85, %87, %cst_58 {dimension_numbers = #tpu.dot_dimension_numbers<[1], [0], [0], [1], [0, 0, 1, 1], [], []>} : vector<16x32xf32>, vector<32x64xf32>, vector<16x64xf32> -> vector<16x64xf32>
    %89 = arith.addf %84, %88 : vector<16x64xf32>
    %c1_59 = arith.constant 1 : index
    %c0_60 = arith.constant 0 : index
    %c0_61 = arith.constant 0 : index
    %90 = vector.load %arg8[%c1_59, %c0_60, %c0_61] : memref<3x1x64xf32, #tpu.memory_space<vmem>>, vector<1x1x64xf32>
    %91 = vector.shape_cast %90 : vector<1x1x64xf32> to vector<1x64xf32>
    %92 = vector.broadcast %91 : vector<1x64xf32> to vector<16x64xf32>
    %93 = arith.addf %89, %92 : vector<16x64xf32>
    %94 = vector.extract_strided_slice %93 {offsets = [0, 0], sizes = [16, 32], strides = [1, 1]} : vector<16x64xf32> to vector<16x32xf32>
    %95 = math.tanh %94 : vector<16x32xf32>
    %96 = vector.extract_strided_slice %93 {offsets = [0, 32], sizes = [16, 32], strides = [1, 1]} : vector<16x64xf32> to vector<16x32xf32>
    %97 = arith.negf %96 : vector<16x32xf32>
    %98 = math.exp %97 : vector<16x32xf32>
    %cst_62 = arith.constant 1.000000e+00 : f32
    %99 = vector.broadcast %cst_62 : f32 to vector<16x32xf32>
    %100 = arith.addf %99, %98 : vector<16x32xf32>
    %101 = arith.divf %99, %100 : vector<16x32xf32>
    %102 = arith.mulf %95, %101 : vector<16x32xf32>
    %c1_63 = arith.constant 1 : index
    %c0_64 = arith.constant 0 : index
    %c0_65 = arith.constant 0 : index
    %103 = vector.load %arg9[%c1_63, %c0_64, %c0_65] : memref<3x32x64xf32, #tpu.memory_space<vmem>>, vector<1x32x64xf32>
    %104 = vector.shape_cast %103 : vector<1x32x64xf32> to vector<32x64xf32>
    %cst_66 = arith.constant dense<0.000000e+00> : vector<16x64xf32>
    %105 = tpu.matmul %102, %104, %cst_66 {dimension_numbers = #tpu.dot_dimension_numbers<[1], [0], [0], [1], [0, 0, 1, 1], [], []>} : vector<16x32xf32>, vector<32x64xf32>, vector<16x64xf32> -> vector<16x64xf32>
    %c1_67 = arith.constant 1 : index
    %c0_68 = arith.constant 0 : index
    %c0_69 = arith.constant 0 : index
    %106 = vector.load %arg10[%c1_67, %c0_68, %c0_69] : memref<3x1x64xf32, #tpu.memory_space<vmem>>, vector<1x1x64xf32>
    %107 = vector.shape_cast %106 : vector<1x1x64xf32> to vector<1x64xf32>
    %108 = vector.broadcast %107 : vector<1x64xf32> to vector<16x64xf32>
    %109 = arith.addf %105, %108 : vector<16x64xf32>
    %110 = vector.extract_strided_slice %109 {offsets = [4, 32], sizes = [8, 32], strides = [1, 1]} : vector<16x64xf32> to vector<8x32xf32>
    %111 = arith.addf %64, %110 : vector<8x32xf32>
    %112 = vector.extract_strided_slice %109 {offsets = [0, 0], sizes = [16, 32], strides = [1, 1]} : vector<16x64xf32> to vector<16x32xf32>
    %113 = vector.extract_strided_slice %70 {offsets = [2, 0], sizes = [16, 32], strides = [1, 1]} : vector<20x32xf32> to vector<16x32xf32>
    %114 = arith.addf %112, %113 : vector<16x32xf32>
    %115 = vector.extract_strided_slice %11 {offsets = [3, 0], sizes = [16, 1], strides = [1, 1]} : vector<22x1xf32> to vector<16x1xf32>
    %116 = vector.broadcast %115 : vector<16x1xf32> to vector<16x32xf32>
    %117 = arith.mulf %114, %116 : vector<16x32xf32>
    %118 = vector.extract_strided_slice %15 {offsets = [7, 0], sizes = [8, 8], strides = [1, 1]} : vector<22x8xf32> to vector<8x8xf32>
    %c2_70 = arith.constant 2 : index
    %c0_71 = arith.constant 0 : index
    %c0_72 = arith.constant 0 : index
    %119 = vector.load %arg7[%c2_70, %c0_71, %c0_72] : memref<3x8x64xf32, #tpu.memory_space<vmem>>, vector<1x8x64xf32>
    %120 = vector.shape_cast %119 : vector<1x8x64xf32> to vector<8x64xf32>
    %cst_73 = arith.constant dense<0.000000e+00> : vector<8x64xf32>
    %121 = tpu.matmul %118, %120, %cst_73 {dimension_numbers = #tpu.dot_dimension_numbers<[1], [0], [0], [1], [0, 0, 1, 1], [], []>} : vector<8x8xf32>, vector<8x64xf32>, vector<8x64xf32> -> vector<8x64xf32>
    %122 = vector.extract_strided_slice %117 {offsets = [0, 0], sizes = [8, 32], strides = [1, 1]} : vector<16x32xf32> to vector<8x32xf32>
    %c2_74 = arith.constant 2 : index
    %c0_75 = arith.constant 0 : index
    %c0_76 = arith.constant 0 : index
    %c0_77 = arith.constant 0 : index
    %123 = vector.load %arg6[%c2_74, %c0_75, %c0_76, %c0_77] : memref<3x3x32x64xf32, #tpu.memory_space<vmem>>, vector<1x1x32x64xf32>
    %124 = vector.shape_cast %123 : vector<1x1x32x64xf32> to vector<32x64xf32>
    %cst_78 = arith.constant dense<0.000000e+00> : vector<8x64xf32>
    %125 = tpu.matmul %122, %124, %cst_78 {dimension_numbers = #tpu.dot_dimension_numbers<[1], [0], [0], [1], [0, 0, 1, 1], [], []>} : vector<8x32xf32>, vector<32x64xf32>, vector<8x64xf32> -> vector<8x64xf32>
    %126 = arith.addf %121, %125 : vector<8x64xf32>
    %127 = vector.extract_strided_slice %117 {offsets = [4, 0], sizes = [8, 32], strides = [1, 1]} : vector<16x32xf32> to vector<8x32xf32>
    %c2_79 = arith.constant 2 : index
    %c1_80 = arith.constant 1 : index
    %c0_81 = arith.constant 0 : index
    %c0_82 = arith.constant 0 : index
    %128 = vector.load %arg6[%c2_79, %c1_80, %c0_81, %c0_82] : memref<3x3x32x64xf32, #tpu.memory_space<vmem>>, vector<1x1x32x64xf32>
    %129 = vector.shape_cast %128 : vector<1x1x32x64xf32> to vector<32x64xf32>
    %cst_83 = arith.constant dense<0.000000e+00> : vector<8x64xf32>
    %130 = tpu.matmul %127, %129, %cst_83 {dimension_numbers = #tpu.dot_dimension_numbers<[1], [0], [0], [1], [0, 0, 1, 1], [], []>} : vector<8x32xf32>, vector<32x64xf32>, vector<8x64xf32> -> vector<8x64xf32>
    %131 = arith.addf %126, %130 : vector<8x64xf32>
    %132 = vector.extract_strided_slice %117 {offsets = [8, 0], sizes = [8, 32], strides = [1, 1]} : vector<16x32xf32> to vector<8x32xf32>
    %c2_84 = arith.constant 2 : index
    %c2_85 = arith.constant 2 : index
    %c0_86 = arith.constant 0 : index
    %c0_87 = arith.constant 0 : index
    %133 = vector.load %arg6[%c2_84, %c2_85, %c0_86, %c0_87] : memref<3x3x32x64xf32, #tpu.memory_space<vmem>>, vector<1x1x32x64xf32>
    %134 = vector.shape_cast %133 : vector<1x1x32x64xf32> to vector<32x64xf32>
    %cst_88 = arith.constant dense<0.000000e+00> : vector<8x64xf32>
    %135 = tpu.matmul %132, %134, %cst_88 {dimension_numbers = #tpu.dot_dimension_numbers<[1], [0], [0], [1], [0, 0, 1, 1], [], []>} : vector<8x32xf32>, vector<32x64xf32>, vector<8x64xf32> -> vector<8x64xf32>
    %136 = arith.addf %131, %135 : vector<8x64xf32>
    %c2_89 = arith.constant 2 : index
    %c0_90 = arith.constant 0 : index
    %c0_91 = arith.constant 0 : index
    %137 = vector.load %arg8[%c2_89, %c0_90, %c0_91] : memref<3x1x64xf32, #tpu.memory_space<vmem>>, vector<1x1x64xf32>
    %138 = vector.shape_cast %137 : vector<1x1x64xf32> to vector<1x64xf32>
    %139 = vector.broadcast %138 : vector<1x64xf32> to vector<8x64xf32>
    %140 = arith.addf %136, %139 : vector<8x64xf32>
    %141 = vector.extract_strided_slice %140 {offsets = [0, 0], sizes = [8, 32], strides = [1, 1]} : vector<8x64xf32> to vector<8x32xf32>
    %142 = math.tanh %141 : vector<8x32xf32>
    %143 = vector.extract_strided_slice %140 {offsets = [0, 32], sizes = [8, 32], strides = [1, 1]} : vector<8x64xf32> to vector<8x32xf32>
    %144 = arith.negf %143 : vector<8x32xf32>
    %145 = math.exp %144 : vector<8x32xf32>
    %cst_92 = arith.constant 1.000000e+00 : f32
    %146 = vector.broadcast %cst_92 : f32 to vector<8x32xf32>
    %147 = arith.addf %146, %145 : vector<8x32xf32>
    %148 = arith.divf %146, %147 : vector<8x32xf32>
    %149 = arith.mulf %142, %148 : vector<8x32xf32>
    %c2_93 = arith.constant 2 : index
    %c0_94 = arith.constant 0 : index
    %c0_95 = arith.constant 0 : index
    %150 = vector.load %arg9[%c2_93, %c0_94, %c0_95] : memref<3x32x64xf32, #tpu.memory_space<vmem>>, vector<1x32x64xf32>
    %151 = vector.shape_cast %150 : vector<1x32x64xf32> to vector<32x64xf32>
    %cst_96 = arith.constant dense<0.000000e+00> : vector<8x64xf32>
    %152 = tpu.matmul %149, %151, %cst_96 {dimension_numbers = #tpu.dot_dimension_numbers<[1], [0], [0], [1], [0, 0, 1, 1], [], []>} : vector<8x32xf32>, vector<32x64xf32>, vector<8x64xf32> -> vector<8x64xf32>
    %c2_97 = arith.constant 2 : index
    %c0_98 = arith.constant 0 : index
    %c0_99 = arith.constant 0 : index
    %153 = vector.load %arg10[%c2_97, %c0_98, %c0_99] : memref<3x1x64xf32, #tpu.memory_space<vmem>>, vector<1x1x64xf32>
    %154 = vector.shape_cast %153 : vector<1x1x64xf32> to vector<1x64xf32>
    %155 = vector.broadcast %154 : vector<1x64xf32> to vector<8x64xf32>
    %156 = arith.addf %152, %155 : vector<8x64xf32>
    %157 = vector.extract_strided_slice %156 {offsets = [0, 32], sizes = [8, 32], strides = [1, 1]} : vector<8x64xf32> to vector<8x32xf32>
    %158 = arith.addf %111, %157 : vector<8x32xf32>
    %c0_100 = arith.constant 0 : index
    %c0_101 = arith.constant 0 : index
    %159 = vector.load %arg11[%c0_100, %c0_101] : memref<8x32xf32, #tpu.memory_space<vmem>>, vector<8x32xf32>
    %cst_102 = arith.constant dense<0.000000e+00> : vector<8x8xf32>
    %160 = tpu.matmul %159, %158, %cst_102 {dimension_numbers = #tpu.dot_dimension_numbers<[1], [1], [0], [0], [0, 0, 1, 0], [], []>} : vector<8x32xf32>, vector<8x32xf32>, vector<8x8xf32> -> vector<8x8xf32>
    %c0_103 = arith.constant 0 : index
    %c0_104 = arith.constant 0 : index
    %161 = vector.load %arg12[%c0_103, %c0_104] : memref<8x1xf32, #tpu.memory_space<vmem>>, vector<8x1xf32>
    %162 = vector.broadcast %161 : vector<8x1xf32> to vector<8x8xf32>
    %163 = arith.addf %160, %162 : vector<8x8xf32>
    %164 = vector.shape_cast %163 : vector<8x8xf32> to vector<1x1x8x8xf32>
    %c0_105 = arith.constant 0 : index
    %c0_106 = arith.constant 0 : index
    %c0_107 = arith.constant 0 : index
    %c0_108 = arith.constant 0 : index
    %165 = vector.load %arg13[%c0_105, %c0_106, %c0_107, %c0_108] : memref<1x1x8x8xf32, #tpu.memory_space<vmem>>, vector<1x1x8x8xf32>
    tpu.vector_store %arg13[%c0_105, %c0_106, %c0_107, %c0_108], %164 {strides = array<i32>} : memref<1x1x8x8xf32, #tpu.memory_space<vmem>>, vector<1x1x8x8xf32>,
    return
  }
  func.func @transform_0(%arg0: i32, %arg1: i32) -> (i32, i32, i32, i32) {
    %c0_i32 = arith.constant 0 : i32
    %c0_i32_0 = arith.constant 0 : i32
    %c0_i32_1 = arith.constant 0 : i32
    return %arg0, %arg1, %c0_i32, %c0_i32_0 : i32, i32, i32, i32
  }
  func.func @transform_1(%arg0: i32, %arg1: i32) -> (i32, i32, i32, i32) {
    %c0_i32 = arith.constant 0 : i32
    %c0_i32_0 = arith.constant 0 : i32
    %c0_i32_1 = arith.constant 0 : i32
    return %arg0, %arg1, %c0_i32, %c0_i32_0 : i32, i32, i32, i32
  }
  func.func @transform_2(%arg0: i32, %arg1: i32) -> (i32, i32) {
    %c0_i32 = arith.constant 0 : i32
    %c0_i32_0 = arith.constant 0 : i32
    %c0_i32_1 = arith.constant 0 : i32
    return %c0_i32, %c0_i32_0 : i32, i32
  }
  func.func @transform_3(%arg0: i32, %arg1: i32) -> (i32, i32) {
    %c0_i32 = arith.constant 0 : i32
    %c0_i32_0 = arith.constant 0 : i32
    %c0_i32_1 = arith.constant 0 : i32
    return %c0_i32, %c0_i32_0 : i32, i32
  }
  func.func @transform_4(%arg0: i32, %arg1: i32) -> (i32, i32, i32, i32) {
    %c0_i32 = arith.constant 0 : i32
    %c0_i32_0 = arith.constant 0 : i32
    %c0_i32_1 = arith.constant 0 : i32
    %c0_i32_2 = arith.constant 0 : i32
    %c0_i32_3 = arith.constant 0 : i32
    return %c0_i32, %c0_i32_0, %c0_i32_1, %c0_i32_2 : i32, i32, i32, i32
  }
  func.func @transform_5(%arg0: i32, %arg1: i32) -> (i32, i32, i32) {
    %c0_i32 = arith.constant 0 : i32
    %c0_i32_0 = arith.constant 0 : i32
    %c0_i32_1 = arith.constant 0 : i32
    %c0_i32_2 = arith.constant 0 : i32
    return %c0_i32, %c0_i32_0, %c0_i32_1 : i32, i32, i32
  }
  func.func @transform_6(%arg0: i32, %arg1: i32) -> (i32, i32, i32) {
    %c0_i32 = arith.constant 0 : i32
    %c0_i32_0 = arith.constant 0 : i32
    %c0_i32_1 = arith.constant 0 : i32
    %c0_i32_2 = arith.constant 0 : i32
    return %c0_i32, %c0_i32_0, %c0_i32_1 : i32, i32, i32
  }
  func.func @transform_7(%arg0: i32, %arg1: i32) -> (i32, i32, i32) {
    %c0_i32 = arith.constant 0 : i32
    %c0_i32_0 = arith.constant 0 : i32
    %c0_i32_1 = arith.constant 0 : i32
    %c0_i32_2 = arith.constant 0 : i32
    return %c0_i32, %c0_i32_0, %c0_i32_1 : i32, i32, i32
  }
  func.func @transform_8(%arg0: i32, %arg1: i32) -> (i32, i32, i32) {
    %c0_i32 = arith.constant 0 : i32
    %c0_i32_0 = arith.constant 0 : i32
    %c0_i32_1 = arith.constant 0 : i32
    %c0_i32_2 = arith.constant 0 : i32
    return %c0_i32, %c0_i32_0, %c0_i32_1 : i32, i32, i32
  }
  func.func @transform_9(%arg0: i32, %arg1: i32) -> (i32, i32) {
    %c0_i32 = arith.constant 0 : i32
    %c0_i32_0 = arith.constant 0 : i32
    %c0_i32_1 = arith.constant 0 : i32
    return %c0_i32, %c0_i32_0 : i32, i32
  }
  func.func @transform_10(%arg0: i32, %arg1: i32) -> (i32, i32) {
    %c0_i32 = arith.constant 0 : i32
    %c0_i32_0 = arith.constant 0 : i32
    %c0_i32_1 = arith.constant 0 : i32
    return %c0_i32, %c0_i32_0 : i32, i32
  }
  func.func @transform_11(%arg0: i32, %arg1: i32) -> (i32, i32, i32, i32) {
    %c0_i32 = arith.constant 0 : i32
    %c0_i32_0 = arith.constant 0 : i32
    %c0_i32_1 = arith.constant 0 : i32
    return %arg0, %arg1, %c0_i32, %c0_i32_0 : i32, i32, i32, i32
  }
}

</mosaic_0001>

<bundles_post_ra>
// kernel: tpu_custom_call.1
= control target key start
LH: loop header
LB: loop body
LE: loop exit
PB: predicated region body
PF: predicated region fallthrough
CT: control target
= control target key end

     0   :  { %s3448_s0 = inlined_call_operand.vmem [shape: f32[2,2,22,4], index: 0, kind: input, shape index: {}]   ;;  %s3449_s1 = inlined_call_operand.vmem [shape: f32[2,2,22,8], index: 1, kind: input, shape index: {}]   ;;  %s3450_s2 = inlined_call_operand.vmem [shape: f32[4,32], index: 2, kind: input, shape index: {}]   ;;  %s3451_s3 = inlined_call_operand.vmem [shape: f32[1,32], index: 3, kind: input, shape index: {}]   ;;  %s3452_s4 = inlined_call_operand.hbm [shape: f32[3,3,32,64], index: 4, kind: input, shape index: {}]   ;;  %s3453_s5 = inlined_call_operand.vmem [shape: f32[3,8,64], index: 5, kind: input, shape index: {}]   ;;  %s3454_s6 = inlined_call_operand.vmem [shape: f32[3,1,64], index: 6, kind: input, shape index: {}]   ;;  %s3455_s7 = inlined_call_operand.vmem [shape: f32[3,32,64], index: 7, kind: input, shape index: {}]   ;;  %s3456_s8 = inlined_call_operand.vmem [shape: f32[3,1,64], index: 8, kind: input, shape index: {}]   ;;  %s3457_s9 = inlined_call_operand.vmem [shape: f32[8,32], index: 9, kind: input, shape index: {}]   ;;  %s3458_s10 = inlined_call_operand.vmem [shape: f32[8,1], index: 10, kind: input, shape index: {}]   ;;  %s3459_s11 = inlined_call_operand.hbm [shape: f32[2,2,8,8], index: 11, kind: output, shape index: {}]  }
   0x1   :  { %3465 = sst [smem:[#allocation13_spill]] %s3452_s4 }
   0x2   :  { %16 = vsyncpa [#allocation3], 0 }
   0x3   :  { %17 = vsyncpa [#allocation4], 0 }
   0x4   :  { %19 = vsyncpa [#allocation4 + $0x1], 0  ;;  %s2994_s17 = smov 0   ;;  %s2996_s18 = smov 0  }
   0x5   :  { %s2998_s19 = smov 0   ;;  %s3000_s20 = smov 0  }
   0x6   :  { %s3002_s21 = smov 0   ;;  %s3004_s22 = smov 0  }
   0x7   :  { %s3006_s23 = smov 0   ;;  %s3008_s24 = smov 0  }
   0x8 LB: > { %3466 = sst [smem:[#allocation8_spill]] %s2916_s22  ;;  %s2311_s25 = sadd.s32 4294967295, %s2924_s24   ;;  %s2924_s24 = sphi %s3008_s24, %s25_s24   ;;  %s2920_s23 = sphi %s3006_s23, %s3481_s23   ;;  %s2916_s22 = sphi %s3004_s22, %s3480_s22   ;;  %s2912_s21 = sphi %s3002_s21, %s3479_s21   ;;  %s2908_s20 = sphi %s3000_s20, %s3478_s20   ;;  %s2904_s19 = sphi %s2998_s19, %s3484_s19   ;;  %s2900_s18 = sphi %s2996_s18, %s3483_s18   ;;  %s2896_s17 = sphi %s2994_s17, %s3482_s17  }
   0x9   : > { %3467 = sst [smem:[#allocation9_spill]] %s2920_s23  ;;  %s2312_s26 = sadd.s32 4294967294, %s2924_s24  }
   0xa   : > { %s34_s27 = sadd.s32 1, %s2916_s22  ;;  %s37_s28 = sadd.s32 1, %s2920_s23 }
   0xb   : > { %p35_p0 = scmp.ge.s32.totalorder %s34_s27, 2  ;;  %s291_s29 = sadd.s32 1, %s2904_s19 }
   0xc   : > { %p301_p1 = scmp.ne.s32.totalorder %s2904_s19, %s2900_s18  ;;  %p302_p2 = scmp.eq.s32.totalorder %s2311_s25, 3 }
   0xd   : > { %s3486_s27 = smov (%p35_p0, %s34_s27), 0  ;;  %s3488_s28 = smov (!%p35_p0, %s37_s28), %s2920_s23 }
   0xe   : > { %3468 = sst [smem:[#allocation10_spill]] %s3486_s27  ;;  %s287_s30 = ssub.s32 %s2916_s22, %s3486_s27 }
   0xf   : > { %p3046_p3 = por %p302_p2, %p301_p1  ;;  %p39_p4 = scmp.ge.s32.totalorder %s3488_s28, 2 }
  0x10   : > { %p307_p5 = scmp.ne.s32.totalorder %s2900_s18, %s2896_s17  ;;  %p308_p6 = scmp.eq.s32.totalorder %s2312_s26, 3 }
  0x11   : > { %p2313_p7 = scmp.ge.s32.totalorder %s2924_s24, 1  ;;  %s3490_s28 = smov (%p39_p4, %s3488_s28), 0 }
  0x12   : > { %3470 = sst [smem:[#allocation11_spill]] %s3490_s28  ;;  %p3055_p8 = por %p308_p6, %p307_p5 }
  0x13   : > { %p315_p9 = scmp.lt.s32.totalorder %s2924_s24, 5  ;;  %s286_s14 = ssub.s32 %s2920_s23, %s3490_s28 }
  0x14   : > { %s3471_s13 = scalar_select %p3055_p8, 1, 0 }
  0x15   : > { %s288_s15 = sor.u32 %s287_s30, %s286_s14  ;;  %p3062_p10 = pnand %p2313_p7, %p315_p9 }
  0x16   : > { %3472 = sst [smem:[#allocation12_spill]] %s3471_s13  ;;  %p289_p11 = scmp.eq.s32.totalorder %s288_s15, 0 }
  0x17   : > { %p3066_p12 = scmp.eq.s32.totalorder %s2311_s25, 0  ;;  %p2682_p13 = pneg %p3062_p10 }
  0x18   : > { %s3073_s26 = scalar_select %p289_p11, %s2904_s19, %s291_s29  }
  0x19   : > { %s2926_s22 = smov [#allocation2]   ;;  %p3077_p0 = pnand %p3066_p12, %p2682_p13 }
  0x1a   : > { %s333_s13 = sshll.u32 %s2926_s22, 4  ;;  %s334_s13 = int_to_ptr.vmem [resolvable:$true] %s333_s13 }
  0x1b   : > { %p2804_p1 = pneg %p3077_p0  ;;  %s2813_s25 = scalar_lea.vmem %s334_s13, 4608 }
  0x1c   : > { %p2814_p2 = scmp.ne.s32.totalorder %s334_s13, %s2813_s25  ;;  %p2821_p6 = scmp.lt.s32.totalorder %s334_s13, %s334_s13 }
  0x1d   : > { %p2822_p7 = scmp.lt.s32.totalorder %s2813_s25, %s2813_s25 }
  0x1e   : > { %p2816_p4 = pnand %p2814_p2, %p2804_p1 }
  0x1f   : > { %p2823_p9 = por %p2822_p7, %p2821_p6 }
  0x20   : > { %p2817_p5 = pneg %p2816_p4 }
  0x22   : > { %p2824_p11 = pnand %p2823_p9, %p2817_p5 }
  0x24   : > { %2827 = shalt.err (!%p2824_p11)
}
  0x25   : > { %s2927_s29 = smov 128   ;;  %s2928_s22 = smov 8  }
  0x26   : > { %s3476_s4 = sld [smem:[#allocation13_spill]] }
  0x28   : > { %391 = sbr.rel (%p3062_p10) target bundleno = 2261 (0x8d5), region = 64 }
  0x2c   : > { %2685 = dma.hbm_to_vmem [thread:$0]  (!%p3077_p0), %s3476_s4, 4608, %s334_s13, [#allocation3], %s2927_s29, %s2927_s29, %s2928_s22  }
  0x2d   : > { %2887 = dma.done.wait (%p3066_p12), [#allocation3], 4608  }
  0x2e   : > { %2889 = vsyncadd (%p3066_p12), [#allocation3], 4294962688  ;;  %p444_p13 = scmp.lt.s32.totalorder %s2912_s21, 1  ;;  %v2929_v0 = vmov 0.0   ;;  %vm2930_vm0 = vmmov 0   ;;  %p446_p0 = scmp.lt.s32.totalorder %s2908_s20, 1  ;;  %v464_v22 = vlaneseq }
  0x2f   : > { %2481 = vmatprep.subr.mxu0 %v2929_v0  ;;  %2483 = vmatprep.mubr.msk.f32.mxu0 %vm2930_vm0, %v2929_v0  ;;  %vm511_vm1 = vcmask 1043456   ;;  %v493_v1 = vld [vmem:[%s3450_s2] sm:$0xf]  ;;  %v602_v2 = vld [vmem:[#allocation2 + $0x18] sm:$0xff]  ;;  %vm501_vm2 = vcmask 31744   ;;  %vm696_vm3 = vcmask 1046528  }
  0x30   : > { %s445_s13 = scalar_select %p444_p13, %s2912_s21, 1  ;;  %2492 = vmatprep.subr.mxu1 %v2929_v0  ;;  %2500 = vmatprep.mubr.msk.f32.mxu1 %vm2930_vm0, %v2929_v0  ;;  %v598_v3 = vld [vmem:[%s3453_s5] sm:$0xff]  ;;  %v601_v11 = vld [vmem:[#allocation2 + $0x10] sm:$0xff]  ;;  %vm702_vm4 = vcmask 64512   ;;  %v600_v14 = vld [vmem:[#allocation2 + $0x8] sm:$0xff]  ;;  %v465_v23 = vshrl.u32 %v464_v22, 7 }
  0x31   : > { %s447_s27 = scalar_select %p446_p0, %s2908_s20, 1  ;;  %2482 = vmatpush3.msk.msra.mxu0 %vm511_vm1, %v493_v1  ;;  %2493 = vmatpush3.msra.mxu1 %v602_v2  ;;  %v599_v16 = vld [vmem:[#allocation2] sm:$0xff]  ;;  %v892_v18 = vld [vmem:[#allocation2 + $0x58] sm:$0xff]  ;;  %v891_v19 = vld [vmem:[#allocation2 + $0x50] sm:$0xff]  ;;  %vm603_vm11 = vcmask 261120   ;;  %vm893_vm15 = vcmask 1045504  }
  0x32   : > { %s2675_s16 = smul.u32 6, %s445_s13  ;;  %2509 = vmatprep.subr.mxu0 %v2929_v0  ;;  %2494 = vmatprep.subr.mxu1 %v2929_v0  ;;  %v890_v20 = vld [vmem:[#allocation2 + $0x48] sm:$0xff]  ;;  %v889_v21 = vld [vmem:[#allocation2 + $0x40] sm:$0xff]  ;;  %v466_v26 = vadd.s32 8, %v465_v23  ;;  %v467_v28 = vadd.s32 16, %v465_v23  ;;  %v793_v36 = vld [vmem:[#allocation2 + $0x38] sm:$0xff] }
  0x33   : > { %s2674_s30 = smul.u32 3, %s447_s27  ;;  %2495 = vmatpush3.msra.mxu1 %v601_v11  ;;  %v2326_v29 = vld [vmem:[%s3451_s3] ss:$0 sm:$0xff]  ;;  %v792_v40 = vld [vmem:[#allocation2 + $0x30] sm:$0xff]  ;;  %v791_v43 = vld [vmem:[#allocation2 + $0x28] sm:$0xff]  ;;  %s441_s29 = sand.u32 1, %s2900_s18  }
  0x34   : > { %2496 = vmatprep.subr.mxu1 %v2929_v0  ;;  %v790_v49 = vld [vmem:[#allocation2 + $0x20] sm:$0xff] }
  0x35   : > { %s450_s22 = sadd.s32 %s2675_s16, %s2674_s30  ;;  %2497 = vmatpush3.msra.mxu1 %v600_v14  ;;  %v2343_v22 = vld [vmem:[%s3454_s6] ss:$0 sm:$0xff]  ;;  %s2931_s30 = smov 96  }
  0x36   : > { %s2319_s14 = sshll.u32 %s450_s22, 3  ;;  %2498 = vmatprep.subr.mxu1 %v2929_v0  ;;  %s2318_s22 = sshll.u32 %s441_s29, 3 }
  0x37   : > { %s452_s28 = scalar_lea.vmem %s3448_s0, %s2319_s14  ;;  %s461_s27 = scalar_lea.vmem %s3449_s1, %s2319_s14  ;;  %2499 = vmatpush3.msra.mxu1 %v599_v16 }
  0x38   : > { %v487_v4 = vld [vmem:[%s452_s28] sm:$0xff]  ;;  %v488_v5 = vld [vmem:[%s452_s28 + $0x8] sm:$0xff]  ;;  %v489_v6 = vld [vmem:[%s452_s28 + $0x10] sm:$0x3f]  ;;  %2520 = vmatprep.subr.mxu1 %v2929_v0  ;;  %s2321_s28 = sshll.u32 %s2908_s20, 3  ;;  %s2390_s14 = sshll.u32 %s2912_s21, 1 }
  0x39   : > { %2484 = vmatmul.mubr.msk.f32.vlgmr.msra.gmra.mxu0 %vm501_vm2, %v487_v4  ;;  %v3126_v7 = vld [vmem:[%s461_s27] sm:$0xff]  ;;  %v3128_v8 = vld [vmem:[%s461_s27 + $0x8] sm:$0xff]  ;;  %v3134_v13 = vld [vmem:[%s461_s27 + $0x10] sm:$0x3f]  ;;  %s2322_s16 = sadd.s32 4294967289, %s2321_s28  ;;  %s2193_s15 = sadd.s32 %s2908_s20, %s2390_s14 }
  0x3a   : > { %2486 = vmatprep.mubr.msk.f32.mxu0 %vm2930_vm0, %v2929_v0  ;;  %2510 = vmatpush3.msra.mxu0 %v598_v3  ;;  %v697_v9 = vrot.slane %v3126_v7, 1  ;;  %v698_v10 = vrot.slane %v3128_v8, 1  ;;  %v700_v15 = vrot.slane %v3134_v13, 1  ;;  %v468_v24 = vstv %s2322_s16  ;;  %v1037_v3 = vld [vmem:[%s3455_s7 + $0x18] sm:$0xff]  ;;  %v1036_v4 = vld [vmem:[%s3455_s7 + $0x10] sm:$0xff]  ;;  %s2391_s13 = sshll.u32 %s2193_s15, 7 }
  0x3b   : > { %2537 = vmatprep.subr.mxu0 %v2929_v0  ;;  %v469_v25 = vadd.s32 %v468_v24, %v465_v23  ;;  %v470_v27 = vadd.s32 %v468_v24, %v466_v26  ;;  %v471_v30 = vadd.s32 %v468_v24, %v467_v28  ;;  %s443_s4 = scalar_lea.vmem [#allocation5], %s2318_s22  ;;  %s3401_s28 = scalar_lea.hbm %s3459_s11, %s2391_s13 }
  0x3c   : > { %v699_v12 = vsel %vm696_vm3, %v697_v9, %v698_v10  ;;  %v701_v17 = vsel %vm696_vm3, %v698_v10, %v700_v15  ;;  %s2197_s23 = sshll.u32 %s443_s4, 4  ;;  %s2182_s16 = scalar_lea.sflag [#allocation4], %s441_s29  ;;  %s2198_s23 = int_to_ptr.vmem [resolvable:$true] %s2197_s23 }
  0x3d   : > { %2487 = vmatmul.mubr.msk.f32.gmra.mxu0 %vm501_vm2, %v488_v5  ;;  %vm472_vm5 = vcmp.ge.s32.totalorder %v469_v25, 0  ;;  %vm475_vm6 = vcmp.lt.s32.totalorder %v469_v25, 16  ;;  %vm473_vm8 = vcmp.ge.s32.totalorder %v470_v27, 0  ;;  %vm476_vm9 = vcmp.lt.s32.totalorder %v470_v27, 16  ;;  %v1035_v5 = vld [vmem:[%s3455_s7 + $0x8] sm:$0xff]  ;;  %s2828_s25 = scalar_lea.vmem %s2198_s23, 128 }
  0x3e   : > { %2489 = vmatprep.mubr.msk.f32.mxu0 %vm2930_vm0, %v2929_v0  ;;  %vm478_vm7 = vmand %vm472_vm5, %vm475_vm6  ;;  %vm474_vm12 = vcmp.ge.s32.totalorder %v471_v30, 0  ;;  %vm477_vm13 = vcmp.lt.s32.totalorder %v471_v30, 16  ;;  %vm1642_vm5 = vcmask 1041408   ;;  %p2829_p10 = scmp.ne.s32.totalorder %s2198_s23, %s2828_s25  ;;  %s2933_s20 = smov [#allocation5]  }
  0x3f   : > { %v3157_v31 = vsel %vm478_vm7, 1.0, %v2929_v0  ;;  %vm479_vm10 = vmand %vm473_vm8, %vm476_vm9  ;;  %s2832_s21 = sshll.u32 %s2933_s20, 4  ;;  %s2833_s21 = int_to_ptr.vmem [resolvable:$false] %s2832_s21 }
  0x40   : > { %v3161_v37 = vsel %vm479_vm10, 1.0, %v2929_v0  ;;  %vm480_vm14 = vmand %vm474_vm12, %vm477_vm13  ;;  %p2830_p12 = pnand %p2829_p10, %p3046_p3  ;;  %s2834_s22 = scalar_lea.vmem %s2833_s21, 256 }
  0x41   : > { %2490 = vmatmul.mubr.msk.f32.gmra.mxu0 %vm501_vm2, %v489_v6  ;;  %v3169_v44 = vsel %vm480_vm14, 1.0, %v2929_v0  ;;  %vm1244_vm2 = vcmask 1044480   ;;  %p2835_p2 = scmp.lt.s32.totalorder %s2198_s23, %s2833_s21  ;;  %p2836_p4 = scmp.lt.s32.totalorder %s2834_s22, %s2828_s25 }
  0x42   : > { %2511 = vmatprep.mubr.msk.f32.mxu0 %vm2930_vm0, %v2929_v0  ;;  %p2831_p1 = pneg %p2830_p12 }
  0x43   : > { %p2837_p5 = por %p2836_p4, %p2835_p2 }
  0x45   : > { %2512 = vmatmul.mubr.msk.f32.vlgmr.msra.gmra.mxu0 %vm702_vm4, %v699_v12  ;;  %p2838_p6 = pnand %p2837_p5, %p2831_p1 }
  0x46   : > { %2514 = vmatprep.mubr.msk.f32.mxu0 %vm2930_vm0, %v2929_v0  ;;  %2538 = vmatpush3.msra.mxu0 %v892_v18 }
  0x47   : > { %2539 = vmatprep.subr.mxu0 %v2929_v0 }
  0x48   : > { %2540 = vmatpush3.msra.mxu0 %v891_v19 }
  0x49   : > { %2515 = vmatmul.mubr.msk.f32.gmra.mxu0 %vm702_vm4, %v701_v17  ;;  %2541 = vmatprep.subr.mxu0 %v2929_v0 }
  0x4a   : > { %2517 = vmatprep.mubr.msk.f32.mxu0 %vm2930_vm0, %v2929_v0  ;;  %2542 = vmatpush3.msra.mxu0 %v890_v20 }
  0x4b   : > { %2543 = vmatprep.subr.mxu0 %v2929_v0 }
  0x4c   : > { %2544 = vmatpush3.msra.mxu0 %v889_v21 }
  0x4d   : > { %2518 = vmatmul.mubr.msk.f32.gmra.mxu0 %vm702_vm4, %v700_v15 }
  0x4e   : > { %2545 = vmatprep.mubr.msk.f32.mxu0 %vm2930_vm0, %v2929_v0 }
  0xf9   : > { %v581_v32 = vpop.f32.mrf.mxu0 }
  0xfa   : > { %v582_v33 = vadd.f32 %v2326_v29, %v581_v32 }
  0xfb   : > { %v2485_v34 = vpop.f32.mrf.mxu0 }
  0xfc   : > { %v595_v35 = vmul.f32 %v3157_v31, %v582_v33 }
  0xfd   : > { %v586_v38 = vpop.f32.mrf.mxu0 }
  0xfe   : > { %v587_v39 = vadd.f32 %v2326_v29, %v586_v38  ;;  %2501 = vmatmul.mubr.msk.f32.vlgmr.msra.gmra.mxu1 %vm603_vm11, %v595_v35  ;;  %v894_v46 = vrot.slane %v595_v35, 2  ;;  %v794_v55 = vrot.slane %v595_v35, 1 }
  0xff   : > { %v2488_v41 = vpop.f32.mrf.mxu0  ;;  %2521 = vmatpush3.msra.mxu1 %v793_v36  ;;  %2503 = vmatprep.mubr.msk.f32.mxu1 %vm2930_vm0, %v2929_v0 }
 0x100   : > { %v596_v42 = vmul.f32 %v3161_v37, %v587_v39  ;;  %2522 = vmatprep.subr.mxu1 %v2929_v0 }
 0x101   : > { %v591_v45 = vpop.f32.mrf.mxu0  ;;  %2523 = vmatpush3.msra.mxu1 %v792_v40 }
 0x102   : > { %v895_v47 = vrot.slane %v596_v42, 2  ;;  %v592_v48 = vadd.f32 %v2326_v29, %v591_v45  ;;  %2504 = vmatmul.mubr.msk.f32.gmra.mxu1 %vm603_vm11, %v596_v42  ;;  %2524 = vmatprep.subr.mxu1 %v2929_v0  ;;  %v795_v53 = vrot.slane %v596_v42, 1 }
 0x103   : > { %v2491_v50 = vpop.f32.mrf.mxu0  ;;  %2506 = vmatprep.mubr.msk.f32.mxu1 %vm2930_vm0, %v2929_v0  ;;  %2525 = vmatpush3.msra.mxu1 %v791_v43 }
 0x104   : > { %v597_v51 = vmul.f32 %v3169_v44, %v592_v48  ;;  %v896_v52 = vsel %vm893_vm15, %v894_v46, %v895_v47  ;;  %2526 = vmatprep.subr.mxu1 %v2929_v0  ;;  %v3190_v58 = vsel %vm696_vm3, %v794_v55, %v795_v53 }
 0x105   : > { %2546 = vmatmul.mubr.msk.f32.vlgmr.msra.gmra.mxu0 %vm603_vm11, %v896_v52  ;;  %2527 = vmatpush3.msra.mxu1 %v790_v49  ;;  %v775_v60 = vpop.f32.mrf.mxu0  ;;  %v1034_v49 = vld [vmem:[%s3455_s7] sm:$0xff] }
 0x106   : > { %v897_v54 = vrot.slane %v597_v51, 2  ;;  %2507 = vmatmul.mubr.msk.f32.gmra.mxu1 %vm603_vm11, %v597_v51  ;;  %2548 = vmatprep.mubr.msk.f32.mxu0 %vm2930_vm0, %v2929_v0  ;;  %v3186_v57 = vrot.slane %v597_v51, 1 }
 0x107   : > { %2528 = vmatprep.mubr.msk.f32.mxu1 %vm2930_vm0, %v2929_v0  ;;  %2554 = vmatprep.subr.mxu1 %v2929_v0  ;;  %v2513_v61 = vpop.f32.mrf.mxu0 }
 0x108   : > { %v898_v56 = vsel %vm893_vm15, %v895_v47, %v897_v54  ;;  %v3201_v59 = vsel %vm696_vm3, %v795_v53, %v3186_v57  ;;  %v1162_v53 = vld [vmem:[#allocation2 + $0x78] sm:$0xff] }
 0x109   : > { %2549 = vmatmul.mubr.msk.f32.gmra.mxu0 %vm603_vm11, %v898_v56  ;;  %v780_v62 = vpop.f32.mrf.mxu0  ;;  %2571 = vmatprep.subr.mxu0 %v1162_v53 }
 0x10a   : > { %2529 = vmatmul.mubr.msk.f32.vlgmr.msra.gmra.mxu1 %vm603_vm11, %v3190_v58  ;;  %2551 = vmatprep.mubr.msk.f32.mxu0 %vm2930_vm0, %v2929_v0 }
 0x10b   : > { %2531 = vmatprep.mubr.msk.f32.mxu1 %vm2930_vm0, %v2929_v0  ;;  %v2516_v63 = vpop.f32.mrf.mxu0  ;;  %2555 = vmatpush3.msra.mxu1 %v1037_v3 }
 0x10c   : > { %2556 = vmatprep.subr.mxu1 %v2929_v0  ;;  %2572 = vmatpush3.msra.mxu0 %v1162_v53 }
 0x10d   : > { %2552 = vmatmul.mubr.msk.f32.gmra.mxu0 %vm603_vm11, %v897_v54  ;;  %v785_v1 = vpop.f32.mrf.mxu0  ;;  %2557 = vmatpush3.msra.mxu1 %v1036_v4 }
 0x10e   : > { %2532 = vmatmul.mubr.msk.f32.gmra.mxu1 %vm603_vm11, %v3201_v59  ;;  %2558 = vmatprep.subr.mxu1 %v2929_v0 }
 0x10f   : > { %2534 = vmatprep.mubr.msk.f32.mxu1 %vm2930_vm0, %v2929_v0  ;;  %v2519_v2 = vpop.f32.mrf.mxu0  ;;  %2559 = vmatpush3.msra.mxu1 %v1035_v5 }
 0x110   : > { %2560 = vmatprep.subr.mxu1 %v2929_v0 }
 0x111   : > { %2561 = vmatpush3.msra.mxu1 %v1034_v49 }
 0x112   : > { %2535 = vmatmul.mubr.msk.f32.gmra.mxu1 %vm603_vm11, %v3186_v57 }
 0x113   : > { %2562 = vmatprep.mubr.msk.f32.mxu1 %vm2930_vm0, %v2929_v0 }
 0x1be   : > { %v679_v6 = vpop.f32.mrf.mxu1 }
 0x1bf   : > { %v776_v17 = vadd.f32 %v775_v60, %v679_v6  ;;  %v1161_v6 = vld [vmem:[#allocation2 + $0x70] sm:$0xff] }
 0x1c0   : > { %v2502_v9 = vpop.f32.mrf.mxu1  ;;  %2573 = vmatprep.subr.mxu0 %v1161_v6 }
 0x1c1   : > { %2574 = vmatpush3.msra.mxu0 %v1161_v6  ;;  %v1160_v9 = vld [vmem:[#allocation2 + $0x68] sm:$0xff] }
 0x1c2   : > { %v684_v10 = vpop.f32.mrf.mxu1  ;;  %2575 = vmatprep.subr.mxu0 %v1160_v9 }
 0x1c3   : > { %v781_v24 = vadd.f32 %v780_v62, %v684_v10  ;;  %2576 = vmatpush3.msra.mxu0 %v1160_v9  ;;  %v1159_v10 = vld [vmem:[#allocation2 + $0x60] sm:$0xff] }
 0x1c4   : > { %v2505_v11 = vpop.f32.mrf.mxu1  ;;  %2577 = vmatprep.subr.mxu0 %v1159_v10 }
 0x1c5   : > { %v971_v12 = vpop.f32.mrf.mxu0  ;;  %v1333_v11 = vld [vmem:[#allocation2 + $0x98] sm:$0xff]  ;;  %2578 = vmatpush3.msra.mxu0 %v1159_v10  ;;  %v2361_v10 = vld [vmem:[%s3454_s6 + $0x1] ss:$0 sm:$0xff] }
 0x1c6   : > { %v689_v14 = vpop.f32.mrf.mxu1  ;;  %2587 = vmatprep.subr.mxu1 %v1333_v11 }
 0x1c7   : > { %v2547_v15 = vpop.f32.mrf.mxu0  ;;  %v786_v33 = vadd.f32 %v785_v1, %v689_v14  ;;  %v1332_v14 = vld [vmem:[#allocation2 + $0x90] sm:$0xff] }
 0x1c8   : > { %v2508_v16 = vpop.f32.mrf.mxu1  ;;  %v1331_v15 = vld [vmem:[#allocation2 + $0x88] sm:$0xff] }
 0x1c9   : > { %v976_v18 = vpop.f32.mrf.mxu0  ;;  %v1330_v16 = vld [vmem:[#allocation2 + $0x80] sm:$0xff] }
 0x1ca   : > { %v871_v19 = vpop.f32.mrf.mxu1 }
 0x1cb   : > { %v885_v20 = vadd.f32 %v871_v19, %v776_v17  ;;  %v2550_v21 = vpop.f32.mrf.mxu0  ;;  %v1145_v17 = vrot.slane %v3157_v31, 1  ;;  %v2347_v19 = vld [vmem:[%s3456_s8] ss:$0 sm:$0xff] }
 0x1cc   : > { %v2530_v23 = vpop.f32.mrf.mxu1 }
 0x1cd   : > { %v985_v25 = vadd.f32 %v971_v12, %v885_v20  ;;  %v981_v26 = vpop.f32.mrf.mxu0  ;;  %v2351_v12 = vld [vmem:[%s3453_s5 + $0x8] sm:$0xff] }
 0x1ce   : > { %v876_v27 = vpop.f32.mrf.mxu1  ;;  %2582 = vmatprep.subr.mxu0 %v2351_v12 }
 0x1cf   : > { %v995_v28 = vadd.f32 %v2343_v22, %v985_v25  ;;  %v886_v29 = vadd.f32 %v876_v27, %v781_v24  ;;  %v2553_v30 = vpop.f32.mrf.mxu0 }
 0x1d0   : > { %v2533_v32 = vpop.f32.mrf.mxu1  ;;  %v1246_v30 = vrot.slane %v3128_v8, 3 }
 0x1d1   : > { %v2344_v34 = vmul.f32 -1.442695, %v995_v28  ;;  %v986_v35 = vadd.f32 %v976_v18, %v886_v29  ;;  %v1146_v18 = vrot.slane %v3161_v37, 1  ;;  %v1245_v29 = vrot.slane %v3126_v7, 3 }
 0x1d2   : > { %v881_v36 = vpop.f32.mrf.mxu1 }
 0x1d3   : > { %2766 = vpow2.f32 %v2344_v34  ;;  %v996_v38 = vadd.f32 %v2343_v22, %v986_v35  ;;  %v887_v39 = vadd.f32 %v881_v36, %v786_v33  ;;  %v1147_v23 = vsel %vm696_vm3, %v1145_v17, %v1146_v18 }
 0x1d4   : > { %v2536_v40 = vpop.f32.mrf.mxu1  ;;  %v1248_v35 = vrot.slane %v3134_v13, 3 }
 0x1d5   : > { %v2345_v41 = vmul.f32 -1.442695, %v996_v38  ;;  %v987_v42 = vadd.f32 %v981_v26, %v887_v39  ;;  %v1247_v39 = vsel %vm1244_vm2, %v1245_v29, %v1246_v30 }
 0x1d7   : > { %2768 = vpow2.f32 %v2345_v41  ;;  %v997_v43 = vadd.f32 %v2343_v22, %v987_v42  ;;  %v1148_v22 = vrot.slane %v3169_v44, 1  ;;  %v1425_v41 = vld [vmem:[#allocation2 + $0xb8] sm:$0xff] }
 0x1d9   : > { %v2346_v45 = vmul.f32 -1.442695, %v997_v43  ;;  %v1149_v32 = vsel %vm696_vm3, %v1146_v18, %v1148_v22  ;;  %vm1743_vm3 = vcmask 1040384  }
 0x1db   : > { %2770 = vpow2.f32 %v2346_v45 }
 0x1e0   : > { %v2767_v46 = vpop.eup %2766 }
 0x1e1   : > { %v1010_v47 = vadd.f32 1.0, %v2767_v46 }
 0x1e3   : > { %2772 = vrcp.f32 %v1010_v47 }
 0x1e4   : > { %v2769_v48 = vpop.eup %2768 }
 0x1e5   : > { %v1011_v50 = vadd.f32 1.0, %v2769_v48 }
 0x1e7   : > { %2774 = vrcp.f32 %v1011_v50 }
 0x1e8   : > { %v2771_v51 = vpop.eup %2770 }
 0x1e9   : > { %v1012_v52 = vadd.f32 1.0, %v2771_v51  ;;  %v1423_v51 = vld [vmem:[#allocation2 + $0xa8] sm:$0xff] }
 0x1eb   : > { %2776 = vrcp.f32 %v1012_v52 }
 0x1ec   : > { %2778 = vtanh.f32 %v995_v28 }
 0x1ed   : > { %2780 = vtanh.f32 %v996_v38 }
 0x1ee   : > { %2782 = vtanh.f32 %v997_v43 }
 0x1f0   : > { %v2773_v54 = vpop.eup %2772 }
 0x1f1   : > { %1022 = vrot.lane.b32.xlu0 %v2773_v54, %s2931_s30  ;;  %v1422_v54 = vld [vmem:[#allocation2 + $0xa0] sm:$0xff] }
 0x1f4   : > { %v2775_v55 = vpop.eup %2774 }
 0x1f5   : > { %1024 = vrot.lane.b32.xlu0 %v2775_v55, %s2931_s30 }
 0x1f8   : > { %v2777_v56 = vpop.eup %2776 }
 0x1f9   : > { %1026 = vrot.lane.b32.xlu1 %v2777_v56, %s2931_s30  ;;  %v2779_v60 = vpop.eup %2778  ;;  %v2367_v56 = vld [vmem:[%s3455_s7 + $0x38] sm:$0xff] }
 0x1fa   : > { %v2781_v63 = vpop.eup %2780 }
 0x1fb   : > { %v2783_v3 = vpop.eup %2782 }
 0x263   : > { %v1023_v61 = vpop.permute.xlu0 %1022 }
 0x264   : > { %v1031_v62 = vmul.f32 %v2779_v60, %v1023_v61  ;;  %v2366_v60 = vld [vmem:[%s3455_s7 + $0x30] sm:$0xff] }
 0x266   : > { %2563 = vmatmul.mubr.msk.f32.vlgmr.msra.gmra.mxu1 %vm603_vm11, %v1031_v62 }
 0x267   : > { %v1025_v1 = vpop.permute.xlu0 %1024  ;;  %2565 = vmatprep.mubr.msk.f32.mxu1 %vm2930_vm0, %v2929_v0  ;;  %2588 = vmatpush3.msra.mxu1 %v1333_v11 }
 0x268   : > { %v1032_v2 = vmul.f32 %v2781_v63, %v1025_v1  ;;  %2589 = vmatprep.subr.mxu1 %v1332_v14 }
 0x269   : > { %2590 = vmatpush3.msra.mxu1 %v1332_v14 }
 0x26a   : > { %2566 = vmatmul.mubr.msk.f32.gmra.mxu1 %vm603_vm11, %v1032_v2  ;;  %2591 = vmatprep.subr.mxu1 %v1331_v15 }
 0x26b   : > { %v1027_v4 = vpop.permute.xlu1 %1026  ;;  %2568 = vmatprep.mubr.msk.f32.mxu1 %vm2930_vm0, %v2929_v0  ;;  %2592 = vmatpush3.msra.mxu1 %v1331_v15 }
 0x26c   : > { %v1033_v5 = vmul.f32 %v2783_v3, %v1027_v4  ;;  %2593 = vmatprep.subr.mxu1 %v1330_v16 }
 0x26d   : > { %2594 = vmatpush3.msra.mxu1 %v1330_v16 }
 0x26e   : > { %2569 = vmatmul.mubr.msk.f32.gmra.mxu1 %vm603_vm11, %v1033_v5  ;;  %2609 = vmatprep.subr.mxu1 %v2367_v56 }
 0x326   : > { %v1120_v20 = vpop.f32.mrf.mxu1 }
 0x327   : > { %v3247_v21 = vadd.f32 %v2347_v19, %v1120_v20 }
 0x328   : > { %v2564_v24 = vpop.f32.mrf.mxu1 }
 0x329   : > { %v1139_v25 = vadd.f32 %v3247_v21, %v3190_v58 }
 0x32a   : > { %v1125_v26 = vpop.f32.mrf.mxu1 }
 0x32b   : > { %v1153_v27 = vmul.f32 %v1147_v23, %v1139_v25  ;;  %v3253_v28 = vadd.f32 %v2347_v19, %v1125_v26  ;;  %v2365_v25 = vld [vmem:[%s3455_s7 + $0x28] sm:$0xff]  ;;  %v2364_v26 = vld [vmem:[%s3455_s7 + $0x20] sm:$0xff] }
 0x32c   : > { %v2567_v33 = vpop.f32.mrf.mxu1 }
 0x32d   : > { %v1140_v34 = vadd.f32 %v3253_v28, %v3201_v59  ;;  %2579 = vmatprep.mubr.msk.f32.mxu0 %vm603_vm11, %v1153_v27  ;;  %v1335_v43 = vrot.slane %v1153_v27, 2  ;;  %v1249_v59 = vsel %vm1244_vm2, %v1246_v30, %v1248_v35  ;;  %v1426_v48 = vrot.slane %v1153_v27, 4 }
 0x32e   : > { %v1130_v58 = vpop.f32.mrf.mxu1 }
 0x32f   : > { %v1154_v36 = vmul.f32 %v1149_v32, %v1140_v34  ;;  %v1131_v38 = vadd.f32 %v2347_v19, %v1130_v58 }
 0x330   : > { %v2570_v40 = vpop.f32.mrf.mxu1 }
 0x331   : > { %v1141_v42 = vadd.f32 %v1131_v38, %v3186_v57  ;;  %2580 = vmatmul.mubr.msk.f32.vlgmr.msra.gmra.mxu0 %vm603_vm11, %v1154_v36  ;;  %v1336_v45 = vrot.slane %v1154_v36, 2  ;;  %v1427_v46 = vrot.slane %v1154_v36, 4  ;;  %v1424_v57 = vld [vmem:[#allocation2 + $0xb0] sm:$0xff]  ;;  %v1669_v36 = vld [vmem:[#allocation2 + $0xd8] sm:$0xff]  ;;  %v1744_v40 = vrot.slane %v3126_v7, 7 }
 0x332   : > { %2583 = vmatpush3.msra.mxu0 %v2351_v12  ;;  %2584 = vmatprep.mubr.msk.f32.mxu0 %vm702_vm4, %v1247_v39  ;;  %v1668_v38 = vld [vmem:[#allocation2 + $0xd0] sm:$0xff] }
 0x333   : > { %v1155_v13 = vmul.f32 %v1148_v22, %v1141_v42  ;;  %v3268_v47 = vsel %vm893_vm15, %v1335_v43, %v1336_v45  ;;  %2598 = vmatprep.subr.mxu0 %v1425_v41  ;;  %v1428_v50 = vsel %vm511_vm1, %v1426_v48, %v1427_v46  ;;  %v2372_v39 = vld [vmem:[%s3453_s5 + $0x10] sm:$0xff]  ;;  %v1667_v42 = vld [vmem:[#allocation2 + $0xc8] sm:$0xff]  ;;  %v1657_v48 = vrot.slane %v3169_v44, 3 }
 0x334   : > { %2595 = vmatprep.mubr.msk.f32.mxu1 %vm603_vm11, %v3268_v47  ;;  %v1822_v7 = vld [vmem:[#allocation2 + $0xf0] sm:$0xff] }
 0x335   : > { %v1338_v49 = vrot.slane %v1155_v13, 2  ;;  %2585 = vmatmul.mubr.msk.f32.vlgmr.msra.gmra.mxu0 %vm702_vm4, %v1249_v59  ;;  %v1429_v53 = vrot.slane %v1155_v13, 4  ;;  %v1820_v59 = vld [vmem:[#allocation2 + $0xe0] sm:$0xff]  ;;  %v1655_v13 = vrot.slane %v3161_v37, 3 }
 0x336   : > { %2599 = vmatpush3.msra.mxu0 %v1425_v41  ;;  %2606 = vmatprep.mubr.msk.f32.mxu0 %vm603_vm11, %v1428_v50  ;;  %v1745_v41 = vrot.slane %v3128_v8, 7  ;;  %v1821_v8 = vld [vmem:[#allocation2 + $0xe8] sm:$0xff] }
 0x337   : > { %2600 = vmatprep.subr.mxu0 %v1424_v57  ;;  %v3276_v52 = vsel %vm893_vm15, %v1336_v45, %v1338_v49  ;;  %v1430_v55 = vsel %vm511_vm1, %v1427_v46, %v1429_v53  ;;  %v1823_v45 = vld [vmem:[#allocation2 + $0xf8] sm:$0xff]  ;;  %v1666_v46 = vld [vmem:[#allocation2 + $0xc0] sm:$0xff]  ;;  %v1654_v49 = vrot.slane %v3157_v31, 3  ;;  %v1658_v53 = vsel %vm1244_vm2, %v1655_v13, %v1657_v48 }
 0x338   : > { %2601 = vmatpush3.msra.mxu0 %v1424_v57  ;;  %2596 = vmatmul.mubr.msk.f32.vlgmr.msra.gmra.mxu1 %vm603_vm11, %v3276_v52  ;;  %v1746_v43 = vsel %vm1743_vm3, %v1744_v40, %v1745_v41  ;;  %v2369_v57 = vld [vmem:[%s3456_s8 + $0x1] ss:$0 sm:$0xff] }
 0x339   : > { %2602 = vmatprep.subr.mxu0 %v1423_v51  ;;  %2610 = vmatpush3.msra.mxu1 %v2367_v56 }
 0x33a   : > { %2603 = vmatpush3.msra.mxu0 %v1423_v51  ;;  %2611 = vmatprep.subr.mxu1 %v2366_v60 }
 0x33b   : > { %2604 = vmatprep.subr.mxu0 %v1422_v54  ;;  %2612 = vmatpush3.msra.mxu1 %v2366_v60  ;;  %v1656_v60 = vsel %vm1244_vm2, %v1654_v49, %v1655_v13 }
 0x33c   : > { %2605 = vmatpush3.msra.mxu0 %v1422_v54  ;;  %2613 = vmatprep.subr.mxu1 %v2365_v25 }
 0x33d   : > { %2607 = vmatmul.mubr.msk.f32.vlgmr.msra.gmra.mxu0 %vm603_vm11, %v1430_v55  ;;  %2620 = vmatprep.subr.mxu0 %v2929_v0 }
 0x33e   : > { %2628 = vmatprep.mubr.msk.f32.mxu0 %vm2930_vm0, %v2929_v0  ;;  %2614 = vmatpush3.msra.mxu1 %v2365_v25 }
 0x33f   : > { %2615 = vmatprep.subr.mxu1 %v2364_v26  ;;  %2621 = vmatpush3.msra.mxu0 %v1669_v36  ;;  %v2092_v36 = vld [vmem:[%s3458_s10] sm:$0xff] }
 0x340   : > { %2616 = vmatpush3.msra.mxu1 %v2364_v26  ;;  %2622 = vmatprep.subr.mxu0 %v2929_v0 }
 0x341   : > { %2631 = vmatprep.subr.mxu1 %v2929_v0  ;;  %2623 = vmatpush3.msra.mxu0 %v1668_v38 }
 0x342   : > { %2624 = vmatprep.subr.mxu0 %v2929_v0 }
 0x343   : > { %2625 = vmatpush3.msra.mxu0 %v1667_v42 }
 0x344   : > { %2626 = vmatprep.subr.mxu0 %v2929_v0 }
 0x345   : > { %2627 = vmatpush3.msra.mxu0 %v1666_v46 }
 0x346   : > { %2647 = vmatprep.subr.mxu0 %v2929_v0 }
 0x3f1   : > { %v2581_v61 = vpop.f32.mrf.mxu0 }
 0x3f3   : > { %v1235_v62 = vpop.f32.mrf.mxu0 }
 0x3f5   : > { %v2586_v63 = vpop.f32.mrf.mxu0 }
 0x3f6   : > { %v1326_v2 = vadd.f32 %v2586_v63, %v2581_v61  ;;  %v1905_v63 = vld [vmem:[#allocation2 + $0x118] sm:$0xff] }
 0x3f7   : > { %v1320_v1 = vpop.f32.mrf.mxu0 }
 0x3f8   : > { %v2597_v3 = vpop.f32.mrf.mxu1  ;;  %v1321_v4 = vadd.f32 %v1320_v1, %v1235_v62 }
 0x3f9   : > { %v1420_v6 = vadd.f32 %v2597_v3, %v1326_v2  ;;  %v1904_v3 = vld [vmem:[#allocation2 + $0x110] sm:$0xff] }
 0x3fa   : > { %v1410_v5 = vpop.f32.mrf.mxu1 }
 0x3fb   : > { %v1419_v11 = vadd.f32 %v1410_v5, %v1321_v4  ;;  %v1903_v4 = vld [vmem:[#allocation2 + $0x108] sm:$0xff]  ;;  %v1902_v5 = vld [vmem:[#allocation2 + $0x100] sm:$0xff] }
 0x3fd   : > { %v2608_v9 = vpop.f32.mrf.mxu0 }
 0x3fe   : > { %v1511_v12 = vadd.f32 %v2608_v9, %v1420_v6 }
 0x3ff   : > { %v1501_v14 = vpop.f32.mrf.mxu0 }
 0x400   : > { %v1521_v15 = vadd.f32 %v2361_v10, %v1511_v12  ;;  %v1510_v16 = vadd.f32 %v1501_v14, %v1419_v11  ;;  %v2382_v11 = vld [vmem:[%s3455_s7 + $0x50] sm:$0xff]  ;;  %v2381_v12 = vld [vmem:[%s3455_s7 + $0x48] sm:$0xff] }
 0x402   : > { %v2363_v17 = vmul.f32 -1.442695, %v1521_v15  ;;  %v1520_v18 = vadd.f32 %v2361_v10, %v1510_v16  ;;  %v2383_v10 = vld [vmem:[%s3455_s7 + $0x58] sm:$0xff] }
 0x404   : > { %2784 = vpow2.f32 %v2363_v17  ;;  %v2362_v19 = vmul.f32 -1.442695, %v1520_v18 }
 0x406   : > { %2786 = vpow2.f32 %v2362_v19 }
 0x411   : > { %v2785_v20 = vpop.eup %2784 }
 0x412   : > { %v1531_v22 = vadd.f32 1.0, %v2785_v20 }
 0x413   : > { %v2787_v23 = vpop.eup %2786 }
 0x414   : > { %2788 = vrcp.f32 %v1531_v22  ;;  %v1530_v24 = vadd.f32 1.0, %v2787_v23  ;;  %v2378_v22 = vld [vmem:[%s3454_s6 + $0x2] ss:$0 sm:$0xff] }
 0x416   : > { %2790 = vrcp.f32 %v1530_v24 }
 0x417   : > { %2792 = vtanh.f32 %v1520_v18 }
 0x418   : > { %2794 = vtanh.f32 %v1521_v15 }
 0x421   : > { %v2789_v27 = vpop.eup %2788 }
 0x422   : > { %1540 = vrot.lane.b32.xlu0 %v2789_v27, %s2931_s30 }
 0x423   : > { %v2791_v29 = vpop.eup %2790 }
 0x424   : > { %1538 = vrot.lane.b32.xlu1 %v2791_v29, %s2931_s30  ;;  %v2793_v32 = vpop.eup %2792 }
 0x425   : > { %v2795_v34 = vpop.eup %2794 }
 0x494   : > { %v1541_v30 = vpop.permute.xlu0 %1540 }
 0x495   : > { %v1545_v58 = vmul.f32 %v2795_v34, %v1541_v30 }
 0x496   : > { %v1539_v33 = vpop.permute.xlu1 %1538 }
 0x497   : > { %v1544_v35 = vmul.f32 %v2793_v32, %v1539_v33 }
 0x499   : > { %2617 = vmatprep.mubr.msk.f32.mxu1 %vm603_vm11, %v1544_v35  ;;  %v2385_v35 = vld [vmem:[%s3456_s8 + $0x2] ss:$0 sm:$0xff] }
 0x49a   : > { %2618 = vmatmul.mubr.msk.f32.vlgmr.msra.gmra.mxu1 %vm603_vm11, %v1545_v58 }
 0x49b   : > { %2633 = vmatprep.mubr.msk.f32.mxu1 %vm2930_vm0, %v2929_v0  ;;  %2632 = vmatpush3.msra.mxu1 %v2372_v39  ;;  %v2932_v39 = vmov 0  }
 0x49c   : > { %2636 = vmatprep.subr.mxu1 %v2929_v0  ;;  %2764 = vset.pattern.permute.xlu1 %v2932_v39 }
 0x49d   : > { %2765 = vset.pattern.permute.xlu0 %v2932_v39 }
 0x49e   : > { %2634 = vmatmul.mubr.msk.f32.vlgmr.msra.gmra.mxu1 %vm702_vm4, %v1746_v43 }
 0x49f   : > { %2637 = vmatpush3.msra.mxu1 %v1823_v45  ;;  %2644 = vmatprep.mubr.msk.f32.mxu1 %vm2930_vm0, %v2929_v0 }
 0x4a0   : > { %2638 = vmatprep.subr.mxu1 %v2929_v0 }
 0x4a1   : > { %2639 = vmatpush3.msra.mxu1 %v1822_v7 }
 0x4a2   : > { %2640 = vmatprep.subr.mxu1 %v2929_v0 }
 0x4a3   : > { %2641 = vmatpush3.msra.mxu1 %v1821_v8 }
 0x4a4   : > { %2642 = vmatprep.subr.mxu1 %v2929_v0 }
 0x4a5   : > { %2643 = vmatpush3.msra.mxu1 %v1820_v59 }
 0x4a6   : > { %2658 = vmatprep.subr.mxu1 %v2929_v0 }
 0x55a   : > { %v2619_v50 = vpop.f32.mrf.mxu1 }
 0x55b   : > { %v1637_v51 = vadd.f32 %v2619_v50, %v2369_v57 }
 0x55c   : > { %v1631_v54 = vpop.f32.mrf.mxu1 }
 0x55d   : > { %v1653_v55 = vadd.f32 %v1637_v51, %v3276_v52  ;;  %v3332_v56 = vadd.f32 %v2369_v57, %v1631_v54  ;;  %v1644_v37 = vrot.slane %v1637_v51, 6 }
 0x55e   : > { %v1815_v6 = vpop.f32.mrf.mxu1 }
 0x55f   : > { %v1662_v44 = vmul.f32 %v1658_v53, %v1653_v55  ;;  %v1643_v61 = vrot.slane %v3332_v56, 6  ;;  %v1652_v62 = vadd.f32 %v3332_v56, %v3268_v47 }
 0x560   : > { %v2635_v9 = vpop.f32.mrf.mxu1 }
 0x561   : > { %v1661_v31 = vmul.f32 %v1656_v60, %v1652_v62  ;;  %v3341_v1 = vsel %vm1642_vm5, %v1643_v61, %v1644_v37  ;;  %v1826_v52 = vrot.slane %v1662_v44, 4  ;;  %v1648_v41 = vadd.f32 %v1643_v61, %v3247_v21  ;;  %v2091_v21 = vld [vmem:[%s3457_s9] sm:$0xff] }
 0x562   : > { %v1649_v42 = vadd.f32 %v3341_v1, %v3253_v28 }
 0x563   : > { %v1825_v2 = vrot.slane %v1661_v31, 4  ;;  %2629 = vmatmul.mubr.msk.f32.vlgmr.msra.gmra.mxu0 %vm603_vm11, %v1661_v31 }
 0x564   : > { %2648 = vmatpush3.msra.mxu0 %v1905_v63  ;;  %2655 = vmatprep.mubr.msk.f32.mxu0 %vm2930_vm0, %v2929_v0 }
 0x565   : > { %2649 = vmatprep.subr.mxu0 %v2929_v0  ;;  %v1827_v47 = vsel %vm511_vm1, %v1825_v2, %v1826_v52 }
 0x566   : > { %2650 = vmatpush3.msra.mxu0 %v1904_v3  ;;  %2645 = vmatmul.mubr.msk.f32.vlgmr.msra.gmra.mxu1 %vm603_vm11, %v1827_v47 }
 0x567   : > { %2651 = vmatprep.subr.mxu0 %v2929_v0  ;;  %2666 = vmatprep.mubr.msk.f32.mxu1 %vm2930_vm0, %v2929_v0 }
 0x568   : > { %2652 = vmatpush3.msra.mxu0 %v1903_v4  ;;  %2659 = vmatpush3.msra.mxu1 %v2383_v10 }
 0x569   : > { %2653 = vmatprep.subr.mxu0 %v2929_v0  ;;  %2660 = vmatprep.subr.mxu1 %v2929_v0 }
 0x56a   : > { %2654 = vmatpush3.msra.mxu0 %v1902_v5  ;;  %2661 = vmatpush3.msra.mxu1 %v2382_v11 }
 0x56b   : > { %2656 = vmatmul.mubr.msk.f32.vlgmr.msra.gmra.mxu0 %vm603_vm11, %v1662_v44  ;;  %2669 = vmatprep.subr.mxu0 %v2929_v0 }
 0x56c   : > { %2671 = vmatprep.mubr.msk.f32.mxu0 %vm2930_vm0, %v2929_v0  ;;  %2662 = vmatprep.subr.mxu1 %v2929_v0 }
 0x56d   : > { %2663 = vmatpush3.msra.mxu1 %v2381_v12 }
 0x56e   : > { %2664 = vmatprep.subr.mxu1 %v2929_v0  ;;  %v2380_v0 = vld [vmem:[%s3455_s7 + $0x40] sm:$0xff] }
 0x56f   : > { %2665 = vmatpush3.msra.mxu1 %v2380_v0 }
 0x623   : > { %v1739_v14 = vpop.f32.mrf.mxu0 }
 0x624   : > { %v1816_v16 = vadd.f32 %v1815_v6, %v1739_v14 }
 0x625   : > { %v2630_v15 = vpop.f32.mrf.mxu0 }
 0x626   : > { %v1896_v17 = vpop.f32.mrf.mxu1 }
 0x627   : > { %v1900_v19 = vadd.f32 %v1896_v17, %v1816_v16 }
 0x628   : > { %v2646_v18 = vpop.f32.mrf.mxu1 }
 0x62b   : > { %v1974_v20 = vpop.f32.mrf.mxu0 }
 0x62c   : > { %v1978_v23 = vadd.f32 %v1974_v20, %v1900_v19 }
 0x62d   : > { %v2657_v24 = vpop.f32.mrf.mxu0 }
 0x62e   : > { %v1987_v25 = vadd.f32 %v2378_v22, %v1978_v23 }
 0x630   : > { %v2379_v26 = vmul.f32 -1.442695, %v1987_v25 }
 0x632   : > { %2796 = vpow2.f32 %v2379_v26 }
 0x63f   : > { %v2797_v27 = vpop.eup %2796 }
 0x640   : > { %v1992_v29 = vadd.f32 1.0, %v2797_v27 }
 0x642   : > { %2798 = vrcp.f32 %v1992_v29 }
 0x643   : > { %2800 = vtanh.f32 %v1987_v25 }
 0x64f   : > { %v2799_v30 = vpop.eup %2798 }
 0x650   : > { %1996 = vrot.lane.b32.xlu1 %v2799_v30, %s2931_s30  ;;  %v2801_v32 = vpop.eup %2800 }
 0x654   : > { %2095 = vperm.xlu1 %2764, %v2092_v36  }
 0x6c2   : > { %v1997_v33 = vpop.permute.xlu1 %1996 }
 0x6c3   : > { %v1999_v34 = vmul.f32 %v2801_v32, %v1997_v33 }
 0x6c5   : > { %2667 = vmatmul.mubr.msk.f32.vlgmr.msra.gmra.mxu1 %vm603_vm11, %v1999_v34 }
 0x6cf   : > { %v2096_v28 = vpop.permute.xlu1 %2095 }
 0x785   : > { %v2082_v58 = vpop.f32.mrf.mxu1 }
 0x786   : > { %v2083_v38 = vadd.f32 %v2385_v35, %v2082_v58 }
 0x787   : > { %v2668_v40 = vpop.f32.mrf.mxu1 }
 0x788   : > { %v2087_v43 = vrot.slane %v2083_v38, 2 }
 0x78a   : > { %v2089_v45 = vadd.f32 %v2087_v43, %v1648_v41  ;;  %v2090_v46 = vadd.f32 %v2087_v43, %v1649_v42 }
 0x78c   : > { %v2100_v7 = vrot.slane %v2089_v45, 6  ;;  %v2101_v8 = vrot.slane %v2090_v46, 6 }
 0x78e   : > { %v2102_v59 = vsel %vm1642_vm5, %v2100_v7, %v2101_v8 }
 0x78f   : > { %2103 = vrot.lane.b32.xlu0 %v2102_v59, %s2931_s30 }
 0x801   : > { %v2104_v13 = vpop.permute.xlu0 %2103 }
 0x802   : > { %2670 = vmatpush3.xpose.msk.msra.mxu0 %vm603_vm11, %v2104_v13 }
 0x805   : > { %2672 = vmatmul.mubr.msk.f32.vlgmr.msra.gmra.mxu0 %vm603_vm11, %v2091_v21 }
 0x8c5   : > { %v2176_v48 = vpop.f32.mrf.mxu0 }
 0x8c6   : > { %v2177_v57 = vadd.f32 %v2176_v48, %v2096_v28 }
 0x8c7   : > { %v2673_v49 = vpop.f32.mrf.mxu0 }
 0x8c8   : > { %2180 = vst.msk [vmem:[%s443_s4] sm:$0xff] %vm702_vm4, %v2177_v57 }
 0x8c9   : > { %2841 = shalt.err (!%p2838_p6)
}
 0x8ca   : > { %s2842_s14 = scalar_lea.hbm %s3401_s28, 128  ;;  %s2846_s13 = scalar_lea.hbm %s3459_s11, 512 }
 0x8cb   : > { %p2843_p7 = scmp.ne.s32.totalorder %s3401_s28, %s2842_s14  ;;  %p2847_p13 = scmp.lt.s32.totalorder %s3401_s28, %s3459_s11 }
 0x8cc   : > { %p2848_p0 = scmp.lt.s32.totalorder %s2846_s13, %s2842_s14 }
 0x8cd   : > { %p2844_p9 = pnand %p2843_p7, %p3046_p3 }
 0x8ce   : > { %p2849_p10 = por %p2848_p0, %p2847_p13 }
 0x8cf   : > { %p2845_p11 = pneg %p2844_p9 }
 0x8d1   : > { %p2850_p12 = pnand %p2849_p10, %p2845_p11 }
 0x8d3   : > { %2853 = shalt.err (!%p2850_p12)
}
 0x8d4   : > { %2680 = dma.vmem_to_hbm [thread:$0]  (%p3046_p3), %s2198_s23, 128, %s3401_s28, %s2182_s16  }
 0x8d5 PF: > { %p2692_p1 = scmp.ge.s32.totalorder %s2924_s24, 2  ;;  %s2209_s25 = sand.u32 1, %s2896_s17  }
 0x8d6   : > { %s2210_s20 = scalar_lea.sflag [#allocation4], %s2209_s25 }
 0x8d7   : > { %p2687_p2 = pnand %p2692_p1, %p3055_p8 }
 0x8d9   : > { %p2688_p4 = pneg %p2687_p2 }
 0x8db   : > { %2891 = dma.done.wait (%p2688_p4), %s2210_s20, 128  }
 0x8dc   : > { %2893 = vsyncadd (%p2688_p4), %s2210_s20, 4294967168  ;;  %s25_s24 = sadd.s32 1, %s2924_s24   ;;  %s3478_s20 = sld [smem:[#allocation8_spill]] }
 0x8dd   : > { %p22_p5 = scmp.ge.s32.totalorder %s25_s24, 6   ;;  %s3479_s21 = sld [smem:[#allocation9_spill]] }
 0x8de   : > { %s3480_s22 = sld [smem:[#allocation10_spill]]  ;;  %s3482_s17 = smov %s2900_s18 }
 0x8df   : > { %s3481_s23 = sld [smem:[#allocation11_spill]]  ;;  %s3483_s18 = smov %s2904_s19 }
 0x8e0   : > { %s3484_s19 = smov %s3073_s26  ;;  %24 = sbr.rel (!%p22_p5) target bundleno = 8 (0x8), region = 123 }
 0x8e5   :  { %2215 = vsyncpa [#allocation3], 1 }
 0x8e6   :  { %2217 = vsyncpa [#allocation3 + $0x1], 1 }
 0x8e7   :  { %2218 = vsyncpa [#allocation4], 1 }
 0x8e8   :  { %2220 = vsyncpa [#allocation4 + $0x1], 1 }

</bundles_post_ra>
